<compile_context>
chip_gen: v6e
topology: v6e:2x2x1
jax: 0.10.0
libtpu: 0.0.40
codegen_flags: <defaults>
</compile_context>

<pallas_src>
import functools

import jax
import jax.numpy as jnp
from jax.experimental import pallas as pl
from jax.experimental.pallas import tpu as pltpu


# ----------------------------------------------------------------------------
# Frame / window bookkeeping (shared between weight packing and the kernel)
# ----------------------------------------------------------------------------
def _round_up(x, m):
    return (x + m - 1) // m * m


def _frame_consts(H, W):
    """Flattened padded-frame constants (1-pixel zero border, 128-lane aligned)."""
    Hp, Wp = H + 2, W + 2
    L = Hp * Wp                      # valid frame length
    Lr = _round_up(L, 128)           # lane-aligned frame length (stores are dense)
    margin = _round_up(Wp + 1, 128)  # lane-aligned margin, >= one row+col shift
    Le = margin + Lr + margin
    return Hp, Wp, L, Lr, margin, Le


def _convt_windows():
    # 9 unique (sy, sx) shifts of the low-res x1 frame used by the 4 ConvT phases.
    return [(sy, sx) for sy in (-1, 0, 1) for sx in (-1, 0, 1)]


def _shifts_for_phase(q):
    # Row/col shifts of input phase q used across all output phases of a 3x3 conv.
    return (0, 1) if q == 0 else (-1, 0)


def _conv3x3_windows():
    # 16 unique (input_phase, sy, sx) windows used by the 4 output phases of a 3x3 conv.
    wins = []
    for qy in range(2):
        for qx in range(2):
            for sy in _shifts_for_phase(qy):
                for sx in _shifts_for_phase(qx):
                    wins.append((2 * qy + qx, sy, sx))
    return wins


# ----------------------------------------------------------------------------
# One-time weight packing: fold taps (and the concat) into the contraction dim
# ----------------------------------------------------------------------------
def _pack_convt_weight(ct_w):
    """PyTorch ConvTranspose2d weight (Cin, Cout, 4, 4) -> (4*Cout, 9*Cin)."""
    c_in, c_out = ct_w.shape[0], ct_w.shape[1]
    rows = []
    for ry in range(2):
        for rx in range(2):
            cols = []
            for (sy, sx) in _convt_windows():
                dy, dx = sy - ry + 1, sx - rx + 1
                if dy in (0, 1) and dx in (0, 1):
                    cols.append(ct_w[:, :, 3 - ry - 2 * dy, 3 - rx - 2 * dx].T)
                else:
                    cols.append(jnp.zeros((c_out, c_in), ct_w.dtype))
            rows.append(jnp.concatenate(cols, axis=1))
    return jnp.concatenate(rows, axis=0)


def _pack_conv3x3_weight(w):
    """Conv2d weight (O, C, 3, 3) -> (4*O, 16*C), column order = _conv3x3_windows()."""
    O, C = w.shape[0], w.shape[1]
    rows = []
    for ry in range(2):
        for rx in range(2):
            cols = []
            for (q, sy, sx) in _conv3x3_windows():
                qy, qx = q // 2, q % 2
                ty, tx = 2 * sy + qy - ry, 2 * sx + qx - rx
                if ty in (-1, 0, 1) and tx in (-1, 0, 1):
                    cols.append(w[:, :, ty + 1, tx + 1])
                else:
                    cols.append(jnp.zeros((O, C), w.dtype))
            rows.append(jnp.concatenate(cols, axis=1))
    return jnp.concatenate(rows, axis=0)


def prepare_params(params, compute_dtype=jnp.bfloat16):
    ct_w = jnp.asarray(params["ct_w"])     # (Cin, Cout, 4, 4)  PyTorch ConvTranspose2d
    c1_w = jnp.asarray(params["c1_w"])     # (Cout, 2*Cout, 3, 3)
    c2_w = jnp.asarray(params["c2_w"])     # (Cout, Cout, 3, 3)
    c_out = ct_w.shape[1]
    assert c1_w.shape[1] == 2 * c_out, "cat([x2, up]) must have 2*out_channels channels"

    def tile_bias(b):  # per-phase replicated bias, stays f32 (epilogue in f32)
        return jnp.tile(jnp.asarray(b).reshape(c_out, 1), (4, 1)).astype(jnp.float32)

    return {
        "wct": _pack_convt_weight(ct_w).astype(compute_dtype),   # (4*Cout, 9*Cin)
        "bct": tile_bias(params["ct_b"]),
        "w1":  _pack_conv3x3_weight(c1_w).astype(compute_dtype),  # (4*Cout, 32*Cout)
        "b1":  tile_bias(params["c1_b"]),
        "w2":  _pack_conv3x3_weight(c2_w).astype(compute_dtype),  # (4*Cout, 16*Cout)
        "b2":  tile_bias(params["c2_b"]),
    }


# ----------------------------------------------------------------------------
# Fused decoder kernel: ConvT -> [concat] -> Conv3x3+ReLU -> Conv3x3+ReLU
# ----------------------------------------------------------------------------
def _decoder_kernel(x1_ref, x2_ref, mask_ref, wct_ref, bct_ref,
                    w1_ref, b1_ref, w2_ref, b2_ref,
                    o_ref, up_sc, h1_sc, *, Wp, Lr, margin, c_out):
    f32 = jnp.float32
    cdt = up_sc.dtype
    mask = mask_ref[...]                      # (1, Lr); 1.0 at interior frame pixels

    # Zero ONLY the margin strips; the interior [margin, margin+Lr) is fully rewritten
    # every grid step with the frame border masked to zero.  (Do not gate this on
    # program_id: under megacore splitting each core owns its own scratch.)
    zstrip = jnp.zeros((up_sc.shape[0], margin), cdt)
    up_sc[:, :margin] = zstrip
    up_sc[:, margin + Lr:] = zstrip
    h1_sc[:, :margin] = zstrip
    h1_sc[:, margin + Lr:] = zstrip

    def lane(sy, sx):                         # static lane offset of a shifted window
        return margin + sy * Wp + sx

    # ---- ConvTranspose2d k4/s2/p1: all 4 sub-pixel phases in ONE MXU matmul --------
    x1_stack = jnp.concatenate(
        [x1_ref[0, :, lane(sy, sx):lane(sy, sx) + Lr] for (sy, sx) in _convt_windows()],
        axis=0)                                                    # (9*Cin, Lr)
    up = jnp.dot(wct_ref[...], x1_stack, preferred_element_type=f32)
    up = (up + bct_ref[...]) * mask            # bias; zero the frame border / pad lanes
    up_sc[:, margin:margin + Lr] = up.astype(cdt)                  # lane-dense store

    wins = _conv3x3_windows()

    # ---- Conv3x3 + ReLU on cat([x2, up]); concat folded into the contraction -------
    # Per unique window the stacked operand interleaves [x2 channels ; up channels],
    # matching the packed w1 column order, so no explicit cat buffer/copy is needed.
    cat_stack = jnp.concatenate(
        [blk
         for (q, sy, sx) in wins
         for blk in (
             x2_ref[0, q * c_out:(q + 1) * c_out, lane(sy, sx):lane(sy, sx) + Lr],
             up_sc[q * c_out:(q + 1) * c_out, lane(sy, sx):lane(sy, sx) + Lr])],
        axis=0)                                                    # (16*2*Cout, Lr)
    h1 = jnp.dot(w1_ref[...], cat_stack, preferred_element_type=f32)
    h1 = jnp.maximum(h1 + b1_ref[...], 0.0) * mask
    h1_sc[:, margin:margin + Lr] = h1.astype(cdt)                  # lane-dense store

    # ---- Conv3x3 + ReLU -> all 4 output phases in ONE matmul ------------------------
    h1_stack = jnp.concatenate(
        [h1_sc[q * c_out:(q + 1) * c_out, lane(sy, sx):lane(sy, sx) + Lr]
         for (q, sy, sx) in wins],
        axis=0)                                                    # (16*Cout, Lr)
    out = jnp.dot(w2_ref[...], h1_stack, preferred_element_type=f32)
    out = jnp.maximum(out + b2_ref[...], 0.0)    # border/pad lanes cropped host-side
    o_ref[0] = out.astype(o_ref.dtype)           # dense (4*Cout, Lr) store


# ----------------------------------------------------------------------------
# Decoder forward (NCHW in / NCHW out, like PyTorch)
# ----------------------------------------------------------------------------
def decoder_forward(prep, x1_nchw, x2_nchw):
    cdt = prep["wct"].dtype
    c_out = prep["wct"].shape[0] // 4
    c_in = prep["wct"].shape[1] // 9
    B, C1, H1, W1 = x1_nchw.shape
    _, C2, H2, W2 = x2_nchw.shape
    assert C1 == c_in and C2 == c_out and H2 == 2 * H1 and W2 == 2 * W1
    Hp, Wp, L, Lr, margin, Le = _frame_consts(H1, W1)

    # ---- XLA-side input plumbing: pad + flatten + phase-split (no im2col) ----------
    x1p = jnp.pad(x1_nchw, ((0, 0), (0, 0), (1, 1), (1, 1))).reshape(B, c_in, L)
    x1e = jnp.pad(x1p, ((0, 0), (0, 0), (margin, margin + Lr - L))).astype(cdt)

    # x2 split into its 4 sub-pixel phases, phase-major on the channel axis.
    x2r = x2_nchw.reshape(B, c_out, H1, 2, W1, 2)
    x2ph = jnp.transpose(x2r, (0, 3, 5, 1, 2, 4)).reshape(B, 4 * c_out, H1, W1)
    x2ph = jnp.pad(x2ph, ((0, 0), (0, 0), (1, 1), (1, 1))).reshape(B, 4 * c_out, L)
    x2e = jnp.pad(x2ph, ((0, 0), (0, 0), (margin, margin + Lr - L))).astype(cdt)

    # Interior-of-frame mask (zeros on the 1-pixel border and on the [L, Lr) pad lanes).
    mask = jnp.zeros((Hp, Wp), jnp.float32).at[1:-1, 1:-1].set(1.0).reshape(1, L)
    mask = jnp.pad(mask, ((0, 0), (0, Lr - L)))

    kern = functools.partial(_decoder_kernel, Wp=Wp, Lr=Lr, margin=margin, c_out=c_out)

    def full(shape):
        return pl.BlockSpec(shape, lambda b, _n=len(shape): (0,) * _n)

    # VMEM budget from the actual buffers (double-buffered blocks + scratch + stacked
    # matmul operands) instead of a hard-coded cap; clamped to the chip's capacity.
    bpe = jnp.dtype(cdt).itemsize
    blk_in = (c_in * Le + 4 * c_out * Le) * bpe + Lr * 4
    blk_w = (prep["wct"].size + prep["w1"].size + prep["w2"].size) * bpe + 12 * c_out * 4
    blk_out = 4 * c_out * Lr * 4
    scratch_b = 2 * (4 * c_out) * Le * bpe
    stacks_b = (9 * c_in + 32 * c_out + 16 * c_out) * Lr * bpe
    need = 2 * (blk_in + blk_w + blk_out) + scratch_b + stacks_b + (8 << 20)
    try:
        cap = int(getattr(pltpu.get_tpu_info(), "vmem_capacity_bytes", 64 << 20))
    except Exception:
        cap = 64 << 20
    vmem_limit = int(min(max(need, 16 << 20), int(cap * 0.9)))

    out_ph = pl.pallas_call(
        kern,
        out_shape=jax.ShapeDtypeStruct((B, 4 * c_out, Lr), jnp.float32),
        grid=(B,),
        in_specs=[
            pl.BlockSpec((1, c_in, Le), lambda b: (b, 0, 0)),
            pl.BlockSpec((1, 4 * c_out, Le), lambda b: (b, 0, 0)),
            full((1, Lr)),
            full(prep["wct"].shape), full(prep["bct"].shape),
            full(prep["w1"].shape), full(prep["b1"].shape),
            full(prep["w2"].shape), full(prep["b2"].shape),
        ],
        out_specs=pl.BlockSpec((1, 4 * c_out, Lr), lambda b: (b, 0, 0)),
        scratch_shapes=[pltpu.VMEM((4 * c_out, Le), cdt),
                        pltpu.VMEM((4 * c_out, Le), cdt)],
        compiler_params=pltpu.CompilerParams(
            dimension_semantics=("parallel",),
            vmem_limit_bytes=vmem_limit),
    )(x1e, x2e, mask, prep["wct"], prep["bct"], prep["w1"], prep["b1"],
      prep["w2"], prep["b2"])

    # ---- XLA-side output plumbing: crop pad lanes / border, interleave the phases ---
    out_ph = out_ph[:, :, :L].reshape(B, 2, 2, c_out, Hp, Wp)[:, :, :, :, 1:-1, 1:-1]
    out = jnp.transpose(out_ph, (0, 3, 4, 1, 5, 2)).reshape(B, c_out, H2, W2)
    return out


# ----------------------------------------------------------------------------
# Deterministic parameter init (PyTorch-like uniform(-1/sqrt(fan_in), +))
# ----------------------------------------------------------------------------
def init_params(key, in_channels, out_channels):
    assert in_channels == 2 * out_channels, "UNet decoder: cat channels == in_channels"
    ks = jax.random.split(key, 6)

    def u(k, shape, fan_in):
        bound = 1.0 / (fan_in ** 0.5)
        return jax.random.uniform(k, shape, jnp.float32, -bound, bound)

    return {
        "ct_w": u(ks[0], (in_channels, out_channels, 4, 4), out_channels * 16),
        "ct_b": u(ks[1], (out_channels,), out_channels * 16),
        "c1_w": u(ks[2], (out_channels, in_channels, 3, 3), in_channels * 9),
        "c1_b": u(ks[3], (out_channels,), in_channels * 9),
        "c2_w": u(ks[4], (out_channels, out_channels, 3, 3), out_channels * 9),
        "c2_b": u(ks[5], (out_channels,), out_channels * 9),
    }


# ----------------------------------------------------------------------------
# Pure-JAX f32 reference (correctness check only)
# ----------------------------------------------------------------------------
def _reference_forward(params, x1, x2):
    dn = ("NCHW", "OIHW", "NCHW")
    w_ct = jnp.transpose(params["ct_w"][:, :, ::-1, ::-1], (1, 0, 2, 3))
    up = jax.lax.conv_general_dilated(x1, w_ct, (1, 1), ((2, 2), (2, 2)),
                                      lhs_dilation=(2, 2), dimension_numbers=dn)
    up = up + params["ct_b"].reshape(1, -1, 1, 1)
    h = jnp.concatenate([x2, up], axis=1)
    h = jax.lax.conv_general_dilated(h, params["c1_w"], (1, 1), ((1, 1), (1, 1)),
                                     dimension_numbers=dn)
    h = jnp.maximum(h + params["c1_b"].reshape(1, -1, 1, 1), 0.0)
    h = jax.lax.conv_general_dilated(h, params["c2_w"], (1, 1), ((1, 1), (1, 1)),
                                     dimension_numbers=dn)
    return jnp.maximum(h + params["c2_b"].reshape(1, -1, 1, 1), 0.0)


if __name__ == "__main__":
    in_channels, out_channels = 8, 4
    B, H, W = 2, 8, 8                       # x1 spatial; x2 is at 2x resolution

    key = jax.random.PRNGKey(0)
    kp, k1, k2 = jax.random.split(key, 3)
    params = init_params(kp, in_channels, out_channels)
    prep = prepare_params(params)           # one-time weight packing (taps+concat in K)

    x1 = jax.random.normal(k1, (B, in_channels, H, W), jnp.float32)            # (2, 8, 8, 8)
    x2 = jax.random.normal(k2, (B, out_channels, 2 * H, 2 * W), jnp.float32)   # (2, 4, 16, 16)

    out = jax.block_until_ready(jax.jit(decoder_forward)(prep, x1, x2))
    assert out.shape == (B, out_channels, 2 * H, 2 * W), out.shape
    assert bool(jnp.all(jnp.isfinite(out)))

    ref = _reference_forward(params, x1, x2)
    max_err = float(jnp.max(jnp.abs(out - ref)))
    # bf16 MXU operands / bf16 VMEM intermediates vs the f32 reference.
    assert max_err < 1e-1, f"mismatch vs f32 reference: max abs err = {max_err}"
    print("KERNEL_OK")
</pallas_src>

<mosaic_0001>
module attributes {stable_mosaic.version = 11 : i64} {
  func.func @_decoder_kernel(%arg0: i32, %arg1: memref<1x8x384xbf16, #tpu.memory_space<vmem>>, %arg2: memref<1x16x384xbf16, #tpu.memory_space<vmem>>, %arg3: memref<1x128xf32, #tpu.memory_space<vmem>>, %arg4: memref<16x72xbf16, #tpu.memory_space<vmem>>, %arg5: memref<16x1xf32, #tpu.memory_space<vmem>>, %arg6: memref<16x128xbf16, #tpu.memory_space<vmem>>, %arg7: memref<16x1xf32, #tpu.memory_space<vmem>>, %arg8: memref<16x64xbf16, #tpu.memory_space<vmem>>, %arg9: memref<16x1xf32, #tpu.memory_space<vmem>>, %arg10: memref<1x16x128xf32, #tpu.memory_space<vmem>>, %arg11: memref<16x384xbf16, #tpu.memory_space<vmem>>, %arg12: memref<16x384xbf16, #tpu.memory_space<vmem>>) attributes {dimension_semantics = [#tpu.dimension_semantics<parallel>], iteration_bounds = array<i64: 2>, scalar_prefetch = 0 : i64, scratch_operands = 2 : i64, tpu.core_type = #tpu.core_type<tc>, window_params = [{transform_indices = @transform_0, window_bounds = array<i64: 1, 8, 384>}, {transform_indices = @transform_1, window_bounds = array<i64: 1, 16, 384>}, {pipeline_mode = #tpu.pipeline_mode<synchronous>, transform_indices = @transform_2, window_bounds = array<i64: 1, 128>}, {pipeline_mode = #tpu.pipeline_mode<synchronous>, transform_indices = @transform_3, window_bounds = array<i64: 16, 72>}, {pipeline_mode = #tpu.pipeline_mode<synchronous>, transform_indices = @transform_4, window_bounds = array<i64: 16, 1>}, {pipeline_mode = #tpu.pipeline_mode<synchronous>, transform_indices = @transform_5, window_bounds = array<i64: 16, 128>}, {pipeline_mode = #tpu.pipeline_mode<synchronous>, transform_indices = @transform_6, window_bounds = array<i64: 16, 1>}, {pipeline_mode = #tpu.pipeline_mode<synchronous>, transform_indices = @transform_7, window_bounds = array<i64: 16, 64>}, {pipeline_mode = #tpu.pipeline_mode<synchronous>, transform_indices = @transform_8, window_bounds = array<i64: 16, 1>}, {transform_indices = @transform_9, window_bounds = array<i64: 1, 16, 128>}]} {
    %c0 = arith.constant 0 : index
    %c0_0 = arith.constant 0 : index
    %0 = vector.load %arg3[%c0, %c0_0] : memref<1x128xf32, #tpu.memory_space<vmem>>, vector<1x128xf32>
    %cst = arith.constant 0.000000e+00 : bf16
    %1 = vector.broadcast %cst : bf16 to vector<16x128xbf16>
    %c0_1 = arith.constant 0 : index
    %c0_2 = arith.constant 0 : index
    %2 = vector.load %arg11[%c0_1, %c0_2] : memref<16x384xbf16, #tpu.memory_space<vmem>>, vector<16x128xbf16>
    tpu.vector_store %arg11[%c0_1, %c0_2], %1 {strides = array<i32>} : memref<16x384xbf16, #tpu.memory_space<vmem>>, vector<16x128xbf16>,
    %c0_3 = arith.constant 0 : index
    %c256 = arith.constant 256 : index
    %3 = vector.load %arg11[%c0_3, %c256] : memref<16x384xbf16, #tpu.memory_space<vmem>>, vector<16x128xbf16>
    tpu.vector_store %arg11[%c0_3, %c256], %1 {strides = array<i32>} : memref<16x384xbf16, #tpu.memory_space<vmem>>, vector<16x128xbf16>,
    %c0_4 = arith.constant 0 : index
    %c0_5 = arith.constant 0 : index
    %4 = vector.load %arg12[%c0_4, %c0_5] : memref<16x384xbf16, #tpu.memory_space<vmem>>, vector<16x128xbf16>
    tpu.vector_store %arg12[%c0_4, %c0_5], %1 {strides = array<i32>} : memref<16x384xbf16, #tpu.memory_space<vmem>>, vector<16x128xbf16>,
    %c0_6 = arith.constant 0 : index
    %c256_7 = arith.constant 256 : index
    %5 = vector.load %arg12[%c0_6, %c256_7] : memref<16x384xbf16, #tpu.memory_space<vmem>>, vector<16x128xbf16>
    tpu.vector_store %arg12[%c0_6, %c256_7], %1 {strides = array<i32>} : memref<16x384xbf16, #tpu.memory_space<vmem>>, vector<16x128xbf16>,
    %c0_8 = arith.constant 0 : index
    %c0_9 = arith.constant 0 : index
    %c117 = arith.constant 117 : index
    %6 = vector.load %arg1[%c0_8, %c0_9, %c117] : memref<1x8x384xbf16, #tpu.memory_space<vmem>>, vector<1x8x128xbf16>
    %7 = vector.shape_cast %6 : vector<1x8x128xbf16> to vector<8x128xbf16>
    %c0_10 = arith.constant 0 : index
    %c0_11 = arith.constant 0 : index
    %c118 = arith.constant 118 : index
    %8 = vector.load %arg1[%c0_10, %c0_11, %c118] : memref<1x8x384xbf16, #tpu.memory_space<vmem>>, vector<1x8x128xbf16>
    %9 = vector.shape_cast %8 : vector<1x8x128xbf16> to vector<8x128xbf16>
    %c0_12 = arith.constant 0 : index
    %c0_13 = arith.constant 0 : index
    %c119 = arith.constant 119 : index
    %10 = vector.load %arg1[%c0_12, %c0_13, %c119] : memref<1x8x384xbf16, #tpu.memory_space<vmem>>, vector<1x8x128xbf16>
    %11 = vector.shape_cast %10 : vector<1x8x128xbf16> to vector<8x128xbf16>
    %c0_14 = arith.constant 0 : index
    %c0_15 = arith.constant 0 : index
    %c127 = arith.constant 127 : index
    %12 = vector.load %arg1[%c0_14, %c0_15, %c127] : memref<1x8x384xbf16, #tpu.memory_space<vmem>>, vector<1x8x128xbf16>
    %13 = vector.shape_cast %12 : vector<1x8x128xbf16> to vector<8x128xbf16>
    %c0_16 = arith.constant 0 : index
    %c0_17 = arith.constant 0 : index
    %c128 = arith.constant 128 : index
    %14 = vector.load %arg1[%c0_16, %c0_17, %c128] : memref<1x8x384xbf16, #tpu.memory_space<vmem>>, vector<1x8x128xbf16>
    %15 = vector.shape_cast %14 : vector<1x8x128xbf16> to vector<8x128xbf16>
    %c0_18 = arith.constant 0 : index
    %c0_19 = arith.constant 0 : index
    %c129 = arith.constant 129 : index
    %16 = vector.load %arg1[%c0_18, %c0_19, %c129] : memref<1x8x384xbf16, #tpu.memory_space<vmem>>, vector<1x8x128xbf16>
    %17 = vector.shape_cast %16 : vector<1x8x128xbf16> to vector<8x128xbf16>
    %c0_20 = arith.constant 0 : index
    %c0_21 = arith.constant 0 : index
    %c137 = arith.constant 137 : index
    %18 = vector.load %arg1[%c0_20, %c0_21, %c137] : memref<1x8x384xbf16, #tpu.memory_space<vmem>>, vector<1x8x128xbf16>
    %19 = vector.shape_cast %18 : vector<1x8x128xbf16> to vector<8x128xbf16>
    %c0_22 = arith.constant 0 : index
    %c0_23 = arith.constant 0 : index
    %c138 = arith.constant 138 : index
    %20 = vector.load %arg1[%c0_22, %c0_23, %c138] : memref<1x8x384xbf16, #tpu.memory_space<vmem>>, vector<1x8x128xbf16>
    %21 = vector.shape_cast %20 : vector<1x8x128xbf16> to vector<8x128xbf16>
    %c0_24 = arith.constant 0 : index
    %c0_25 = arith.constant 0 : index
    %c139 = arith.constant 139 : index
    %22 = vector.load %arg1[%c0_24, %c0_25, %c139] : memref<1x8x384xbf16, #tpu.memory_space<vmem>>, vector<1x8x128xbf16>
    %23 = vector.shape_cast %22 : vector<1x8x128xbf16> to vector<8x128xbf16>
    %24 = tpu.concatenate %7, %9, %11, %13, %15, %17, %19, %21, %23 in 0 : vector<8x128xbf16>, vector<8x128xbf16>, vector<8x128xbf16>, vector<8x128xbf16>, vector<8x128xbf16>, vector<8x128xbf16>, vector<8x128xbf16>, vector<8x128xbf16>, vector<8x128xbf16> -> vector<72x128xbf16>
    %c0_26 = arith.constant 0 : index
    %c0_27 = arith.constant 0 : index
    %25 = vector.load %arg4[%c0_26, %c0_27] : memref<16x72xbf16, #tpu.memory_space<vmem>>, vector<16x72xbf16>
    %cst_28 = arith.constant dense<0.000000e+00> : vector<16x128xf32>
    %26 = tpu.matmul %25, %24, %cst_28 {dimension_numbers = #tpu.dot_dimension_numbers<[1], [0], [0], [1], [0, 0, 1, 1], [], []>} : vector<16x72xbf16>, vector<72x128xbf16>, vector<16x128xf32> -> vector<16x128xf32>
    %c0_29 = arith.constant 0 : index
    %c0_30 = arith.constant 0 : index
    %27 = vector.load %arg5[%c0_29, %c0_30] : memref<16x1xf32, #tpu.memory_space<vmem>>, vector<16x1xf32>
    %28 = vector.broadcast %27 : vector<16x1xf32> to vector<16x128xf32>
    %29 = arith.addf %26, %28 : vector<16x128xf32>
    %30 = vector.broadcast %0 : vector<1x128xf32> to vector<16x128xf32>
    %31 = arith.mulf %29, %30 : vector<16x128xf32>
    %32 = arith.truncf %31 : vector<16x128xf32> to vector<16x128xbf16>
    %c0_31 = arith.constant 0 : index
    %c128_32 = arith.constant 128 : index
    %33 = vector.load %arg11[%c0_31, %c128_32] : memref<16x384xbf16, #tpu.memory_space<vmem>>, vector<16x128xbf16>
    tpu.vector_store %arg11[%c0_31, %c128_32], %32 {strides = array<i32>} : memref<16x384xbf16, #tpu.memory_space<vmem>>, vector<16x128xbf16>,
    %c0_33 = arith.constant 0 : index
    %c0_34 = arith.constant 0 : index
    %c128_35 = arith.constant 128 : index
    %34 = vector.load %arg2[%c0_33, %c0_34, %c128_35] : memref<1x16x384xbf16, #tpu.memory_space<vmem>>, vector<1x4x128xbf16>
    %35 = vector.shape_cast %34 : vector<1x4x128xbf16> to vector<4x128xbf16>
    %c0_36 = arith.constant 0 : index
    %c128_37 = arith.constant 128 : index
    %36 = vector.load %arg11[%c0_36, %c128_37] : memref<16x384xbf16, #tpu.memory_space<vmem>>, vector<4x128xbf16>
    %c0_38 = arith.constant 0 : index
    %c0_39 = arith.constant 0 : index
    %c129_40 = arith.constant 129 : index
    %37 = vector.load %arg2[%c0_38, %c0_39, %c129_40] : memref<1x16x384xbf16, #tpu.memory_space<vmem>>, vector<1x4x128xbf16>
    %38 = vector.shape_cast %37 : vector<1x4x128xbf16> to vector<4x128xbf16>
    %c0_41 = arith.constant 0 : index
    %c129_42 = arith.constant 129 : index
    %39 = vector.load %arg11[%c0_41, %c129_42] : memref<16x384xbf16, #tpu.memory_space<vmem>>, vector<4x128xbf16>
    %c0_43 = arith.constant 0 : index
    %c0_44 = arith.constant 0 : index
    %c138_45 = arith.constant 138 : index
    %40 = vector.load %arg2[%c0_43, %c0_44, %c138_45] : memref<1x16x384xbf16, #tpu.memory_space<vmem>>, vector<1x4x128xbf16>
    %41 = vector.shape_cast %40 : vector<1x4x128xbf16> to vector<4x128xbf16>
    %c0_46 = arith.constant 0 : index
    %c138_47 = arith.constant 138 : index
    %42 = vector.load %arg11[%c0_46, %c138_47] : memref<16x384xbf16, #tpu.memory_space<vmem>>, vector<4x128xbf16>
    %c0_48 = arith.constant 0 : index
    %c0_49 = arith.constant 0 : index
    %c139_50 = arith.constant 139 : index
    %43 = vector.load %arg2[%c0_48, %c0_49, %c139_50] : memref<1x16x384xbf16, #tpu.memory_space<vmem>>, vector<1x4x128xbf16>
    %44 = vector.shape_cast %43 : vector<1x4x128xbf16> to vector<4x128xbf16>
    %c0_51 = arith.constant 0 : index
    %c139_52 = arith.constant 139 : index
    %45 = vector.load %arg11[%c0_51, %c139_52] : memref<16x384xbf16, #tpu.memory_space<vmem>>, vector<4x128xbf16>
    %c0_53 = arith.constant 0 : index
    %c4 = arith.constant 4 : index
    %c127_54 = arith.constant 127 : index
    %46 = vector.load %arg2[%c0_53, %c4, %c127_54] : memref<1x16x384xbf16, #tpu.memory_space<vmem>>, vector<1x4x128xbf16>
    %47 = vector.shape_cast %46 : vector<1x4x128xbf16> to vector<4x128xbf16>
    %c4_55 = arith.constant 4 : index
    %c127_56 = arith.constant 127 : index
    %48 = vector.load %arg11[%c4_55, %c127_56] : memref<16x384xbf16, #tpu.memory_space<vmem>>, vector<4x128xbf16>
    %c0_57 = arith.constant 0 : index
    %c4_58 = arith.constant 4 : index
    %c128_59 = arith.constant 128 : index
    %49 = vector.load %arg2[%c0_57, %c4_58, %c128_59] : memref<1x16x384xbf16, #tpu.memory_space<vmem>>, vector<1x4x128xbf16>
    %50 = vector.shape_cast %49 : vector<1x4x128xbf16> to vector<4x128xbf16>
    %c4_60 = arith.constant 4 : index
    %c128_61 = arith.constant 128 : index
    %51 = vector.load %arg11[%c4_60, %c128_61] : memref<16x384xbf16, #tpu.memory_space<vmem>>, vector<4x128xbf16>
    %c0_62 = arith.constant 0 : index
    %c4_63 = arith.constant 4 : index
    %c137_64 = arith.constant 137 : index
    %52 = vector.load %arg2[%c0_62, %c4_63, %c137_64] : memref<1x16x384xbf16, #tpu.memory_space<vmem>>, vector<1x4x128xbf16>
    %53 = vector.shape_cast %52 : vector<1x4x128xbf16> to vector<4x128xbf16>
    %c4_65 = arith.constant 4 : index
    %c137_66 = arith.constant 137 : index
    %54 = vector.load %arg11[%c4_65, %c137_66] : memref<16x384xbf16, #tpu.memory_space<vmem>>, vector<4x128xbf16>
    %c0_67 = arith.constant 0 : index
    %c4_68 = arith.constant 4 : index
    %c138_69 = arith.constant 138 : index
    %55 = vector.load %arg2[%c0_67, %c4_68, %c138_69] : memref<1x16x384xbf16, #tpu.memory_space<vmem>>, vector<1x4x128xbf16>
    %56 = vector.shape_cast %55 : vector<1x4x128xbf16> to vector<4x128xbf16>
    %c4_70 = arith.constant 4 : index
    %c138_71 = arith.constant 138 : index
    %57 = vector.load %arg11[%c4_70, %c138_71] : memref<16x384xbf16, #tpu.memory_space<vmem>>, vector<4x128xbf16>
    %c0_72 = arith.constant 0 : index
    %c8 = arith.constant 8 : index
    %c118_73 = arith.constant 118 : index
    %58 = vector.load %arg2[%c0_72, %c8, %c118_73] : memref<1x16x384xbf16, #tpu.memory_space<vmem>>, vector<1x4x128xbf16>
    %59 = vector.shape_cast %58 : vector<1x4x128xbf16> to vector<4x128xbf16>
    %c8_74 = arith.constant 8 : index
    %c118_75 = arith.constant 118 : index
    %60 = vector.load %arg11[%c8_74, %c118_75] : memref<16x384xbf16, #tpu.memory_space<vmem>>, vector<4x128xbf16>
    %c0_76 = arith.constant 0 : index
    %c8_77 = arith.constant 8 : index
    %c119_78 = arith.constant 119 : index
    %61 = vector.load %arg2[%c0_76, %c8_77, %c119_78] : memref<1x16x384xbf16, #tpu.memory_space<vmem>>, vector<1x4x128xbf16>
    %62 = vector.shape_cast %61 : vector<1x4x128xbf16> to vector<4x128xbf16>
    %c8_79 = arith.constant 8 : index
    %c119_80 = arith.constant 119 : index
    %63 = vector.load %arg11[%c8_79, %c119_80] : memref<16x384xbf16, #tpu.memory_space<vmem>>, vector<4x128xbf16>
    %c0_81 = arith.constant 0 : index
    %c8_82 = arith.constant 8 : index
    %c128_83 = arith.constant 128 : index
    %64 = vector.load %arg2[%c0_81, %c8_82, %c128_83] : memref<1x16x384xbf16, #tpu.memory_space<vmem>>, vector<1x4x128xbf16>
    %65 = vector.shape_cast %64 : vector<1x4x128xbf16> to vector<4x128xbf16>
    %c8_84 = arith.constant 8 : index
    %c128_85 = arith.constant 128 : index
    %66 = vector.load %arg11[%c8_84, %c128_85] : memref<16x384xbf16, #tpu.memory_space<vmem>>, vector<4x128xbf16>
    %c0_86 = arith.constant 0 : index
    %c8_87 = arith.constant 8 : index
    %c129_88 = arith.constant 129 : index
    %67 = vector.load %arg2[%c0_86, %c8_87, %c129_88] : memref<1x16x384xbf16, #tpu.memory_space<vmem>>, vector<1x4x128xbf16>
    %68 = vector.shape_cast %67 : vector<1x4x128xbf16> to vector<4x128xbf16>
    %c8_89 = arith.constant 8 : index
    %c129_90 = arith.constant 129 : index
    %69 = vector.load %arg11[%c8_89, %c129_90] : memref<16x384xbf16, #tpu.memory_space<vmem>>, vector<4x128xbf16>
    %c0_91 = arith.constant 0 : index
    %c12 = arith.constant 12 : index
    %c117_92 = arith.constant 117 : index
    %70 = vector.load %arg2[%c0_91, %c12, %c117_92] : memref<1x16x384xbf16, #tpu.memory_space<vmem>>, vector<1x4x128xbf16>
    %71 = vector.shape_cast %70 : vector<1x4x128xbf16> to vector<4x128xbf16>
    %c12_93 = arith.constant 12 : index
    %c117_94 = arith.constant 117 : index
    %72 = vector.load %arg11[%c12_93, %c117_94] : memref<16x384xbf16, #tpu.memory_space<vmem>>, vector<4x128xbf16>
    %c0_95 = arith.constant 0 : index
    %c12_96 = arith.constant 12 : index
    %c118_97 = arith.constant 118 : index
    %73 = vector.load %arg2[%c0_95, %c12_96, %c118_97] : memref<1x16x384xbf16, #tpu.memory_space<vmem>>, vector<1x4x128xbf16>
    %74 = vector.shape_cast %73 : vector<1x4x128xbf16> to vector<4x128xbf16>
    %c12_98 = arith.constant 12 : index
    %c118_99 = arith.constant 118 : index
    %75 = vector.load %arg11[%c12_98, %c118_99] : memref<16x384xbf16, #tpu.memory_space<vmem>>, vector<4x128xbf16>
    %c0_100 = arith.constant 0 : index
    %c12_101 = arith.constant 12 : index
    %c127_102 = arith.constant 127 : index
    %76 = vector.load %arg2[%c0_100, %c12_101, %c127_102] : memref<1x16x384xbf16, #tpu.memory_space<vmem>>, vector<1x4x128xbf16>
    %77 = vector.shape_cast %76 : vector<1x4x128xbf16> to vector<4x128xbf16>
    %c12_103 = arith.constant 12 : index
    %c127_104 = arith.constant 127 : index
    %78 = vector.load %arg11[%c12_103, %c127_104] : memref<16x384xbf16, #tpu.memory_space<vmem>>, vector<4x128xbf16>
    %c0_105 = arith.constant 0 : index
    %c12_106 = arith.constant 12 : index
    %c128_107 = arith.constant 128 : index
    %79 = vector.load %arg2[%c0_105, %c12_106, %c128_107] : memref<1x16x384xbf16, #tpu.memory_space<vmem>>, vector<1x4x128xbf16>
    %80 = vector.shape_cast %79 : vector<1x4x128xbf16> to vector<4x128xbf16>
    %c12_108 = arith.constant 12 : index
    %c128_109 = arith.constant 128 : index
    %81 = vector.load %arg11[%c12_108, %c128_109] : memref<16x384xbf16, #tpu.memory_space<vmem>>, vector<4x128xbf16>
    %82 = tpu.concatenate %35, %36, %38, %39, %41, %42, %44, %45, %47, %48, %50, %51, %53, %54, %56, %57 in 0 : vector<4x128xbf16>, vector<4x128xbf16>, vector<4x128xbf16>, vector<4x128xbf16>, vector<4x128xbf16>, vector<4x128xbf16>, vector<4x128xbf16>, vector<4x128xbf16>, vector<4x128xbf16>, vector<4x128xbf16>, vector<4x128xbf16>, vector<4x128xbf16>, vector<4x128xbf16>, vector<4x128xbf16>, vector<4x128xbf16>, vector<4x128xbf16> -> vector<64x128xbf16>
    %83 = tpu.concatenate %59, %60, %62, %63, %65, %66, %68, %69, %71, %72, %74, %75, %77, %78, %80, %81 in 0 : vector<4x128xbf16>, vector<4x128xbf16>, vector<4x128xbf16>, vector<4x128xbf16>, vector<4x128xbf16>, vector<4x128xbf16>, vector<4x128xbf16>, vector<4x128xbf16>, vector<4x128xbf16>, vector<4x128xbf16>, vector<4x128xbf16>, vector<4x128xbf16>, vector<4x128xbf16>, vector<4x128xbf16>, vector<4x128xbf16>, vector<4x128xbf16> -> vector<64x128xbf16>
    %84 = tpu.concatenate %82, %83 in 0 : vector<64x128xbf16>, vector<64x128xbf16> -> vector<128x128xbf16>
    %c0_110 = arith.constant 0 : index
    %c0_111 = arith.constant 0 : index
    %85 = vector.load %arg6[%c0_110, %c0_111] : memref<16x128xbf16, #tpu.memory_space<vmem>>, vector<16x128xbf16>
    %cst_112 = arith.constant dense<0.000000e+00> : vector<16x128xf32>
    %86 = tpu.matmul %85, %84, %cst_112 {dimension_numbers = #tpu.dot_dimension_numbers<[1], [0], [0], [1], [0, 0, 1, 1], [], []>} : vector<16x128xbf16>, vector<128x128xbf16>, vector<16x128xf32> -> vector<16x128xf32>
    %c0_113 = arith.constant 0 : index
    %c0_114 = arith.constant 0 : index
    %87 = vector.load %arg7[%c0_113, %c0_114] : memref<16x1xf32, #tpu.memory_space<vmem>>, vector<16x1xf32>
    %88 = vector.broadcast %87 : vector<16x1xf32> to vector<16x128xf32>
    %89 = arith.addf %86, %88 : vector<16x128xf32>
    %cst_115 = arith.constant 0.000000e+00 : f32
    %90 = vector.broadcast %cst_115 : f32 to vector<16x128xf32>
    %91 = arith.maximumf %89, %90 : vector<16x128xf32>
    %92 = vector.broadcast %0 : vector<1x128xf32> to vector<16x128xf32>
    %93 = arith.mulf %91, %92 : vector<16x128xf32>
    %94 = arith.truncf %93 : vector<16x128xf32> to vector<16x128xbf16>
    %c0_116 = arith.constant 0 : index
    %c128_117 = arith.constant 128 : index
    %95 = vector.load %arg12[%c0_116, %c128_117] : memref<16x384xbf16, #tpu.memory_space<vmem>>, vector<16x128xbf16>
    tpu.vector_store %arg12[%c0_116, %c128_117], %94 {strides = array<i32>} : memref<16x384xbf16, #tpu.memory_space<vmem>>, vector<16x128xbf16>,
    %c0_118 = arith.constant 0 : index
    %c128_119 = arith.constant 128 : index
    %96 = vector.load %arg12[%c0_118, %c128_119] : memref<16x384xbf16, #tpu.memory_space<vmem>>, vector<4x128xbf16>
    %c0_120 = arith.constant 0 : index
    %c129_121 = arith.constant 129 : index
    %97 = vector.load %arg12[%c0_120, %c129_121] : memref<16x384xbf16, #tpu.memory_space<vmem>>, vector<4x128xbf16>
    %c0_122 = arith.constant 0 : index
    %c138_123 = arith.constant 138 : index
    %98 = vector.load %arg12[%c0_122, %c138_123] : memref<16x384xbf16, #tpu.memory_space<vmem>>, vector<4x128xbf16>
    %c0_124 = arith.constant 0 : index
    %c139_125 = arith.constant 139 : index
    %99 = vector.load %arg12[%c0_124, %c139_125] : memref<16x384xbf16, #tpu.memory_space<vmem>>, vector<4x128xbf16>
    %c4_126 = arith.constant 4 : index
    %c127_127 = arith.constant 127 : index
    %100 = vector.load %arg12[%c4_126, %c127_127] : memref<16x384xbf16, #tpu.memory_space<vmem>>, vector<4x128xbf16>
    %c4_128 = arith.constant 4 : index
    %c128_129 = arith.constant 128 : index
    %101 = vector.load %arg12[%c4_128, %c128_129] : memref<16x384xbf16, #tpu.memory_space<vmem>>, vector<4x128xbf16>
    %c4_130 = arith.constant 4 : index
    %c137_131 = arith.constant 137 : index
    %102 = vector.load %arg12[%c4_130, %c137_131] : memref<16x384xbf16, #tpu.memory_space<vmem>>, vector<4x128xbf16>
    %c4_132 = arith.constant 4 : index
    %c138_133 = arith.constant 138 : index
    %103 = vector.load %arg12[%c4_132, %c138_133] : memref<16x384xbf16, #tpu.memory_space<vmem>>, vector<4x128xbf16>
    %c8_134 = arith.constant 8 : index
    %c118_135 = arith.constant 118 : index
    %104 = vector.load %arg12[%c8_134, %c118_135] : memref<16x384xbf16, #tpu.memory_space<vmem>>, vector<4x128xbf16>
    %c8_136 = arith.constant 8 : index
    %c119_137 = arith.constant 119 : index
    %105 = vector.load %arg12[%c8_136, %c119_137] : memref<16x384xbf16, #tpu.memory_space<vmem>>, vector<4x128xbf16>
    %c8_138 = arith.constant 8 : index
    %c128_139 = arith.constant 128 : index
    %106 = vector.load %arg12[%c8_138, %c128_139] : memref<16x384xbf16, #tpu.memory_space<vmem>>, vector<4x128xbf16>
    %c8_140 = arith.constant 8 : index
    %c129_141 = arith.constant 129 : index
    %107 = vector.load %arg12[%c8_140, %c129_141] : memref<16x384xbf16, #tpu.memory_space<vmem>>, vector<4x128xbf16>
    %c12_142 = arith.constant 12 : index
    %c117_143 = arith.constant 117 : index
    %108 = vector.load %arg12[%c12_142, %c117_143] : memref<16x384xbf16, #tpu.memory_space<vmem>>, vector<4x128xbf16>
    %c12_144 = arith.constant 12 : index
    %c118_145 = arith.constant 118 : index
    %109 = vector.load %arg12[%c12_144, %c118_145] : memref<16x384xbf16, #tpu.memory_space<vmem>>, vector<4x128xbf16>
    %c12_146 = arith.constant 12 : index
    %c127_147 = arith.constant 127 : index
    %110 = vector.load %arg12[%c12_146, %c127_147] : memref<16x384xbf16, #tpu.memory_space<vmem>>, vector<4x128xbf16>
    %c12_148 = arith.constant 12 : index
    %c128_149 = arith.constant 128 : index
    %111 = vector.load %arg12[%c12_148, %c128_149] : memref<16x384xbf16, #tpu.memory_space<vmem>>, vector<4x128xbf16>
    %112 = tpu.concatenate %96, %97, %98, %99, %100, %101, %102, %103, %104, %105, %106, %107, %108, %109, %110, %111 in 0 : vector<4x128xbf16>, vector<4x128xbf16>, vector<4x128xbf16>, vector<4x128xbf16>, vector<4x128xbf16>, vector<4x128xbf16>, vector<4x128xbf16>, vector<4x128xbf16>, vector<4x128xbf16>, vector<4x128xbf16>, vector<4x128xbf16>, vector<4x128xbf16>, vector<4x128xbf16>, vector<4x128xbf16>, vector<4x128xbf16>, vector<4x128xbf16> -> vector<64x128xbf16>
    %c0_150 = arith.constant 0 : index
    %c0_151 = arith.constant 0 : index
    %113 = vector.load %arg8[%c0_150, %c0_151] : memref<16x64xbf16, #tpu.memory_space<vmem>>, vector<16x64xbf16>
    %cst_152 = arith.constant dense<0.000000e+00> : vector<16x128xf32>
    %114 = tpu.matmul %113, %112, %cst_152 {dimension_numbers = #tpu.dot_dimension_numbers<[1], [0], [0], [1], [0, 0, 1, 1], [], []>} : vector<16x64xbf16>, vector<64x128xbf16>, vector<16x128xf32> -> vector<16x128xf32>
    %c0_153 = arith.constant 0 : index
    %c0_154 = arith.constant 0 : index
    %115 = vector.load %arg9[%c0_153, %c0_154] : memref<16x1xf32, #tpu.memory_space<vmem>>, vector<16x1xf32>
    %116 = vector.broadcast %115 : vector<16x1xf32> to vector<16x128xf32>
    %117 = arith.addf %114, %116 : vector<16x128xf32>
    %cst_155 = arith.constant 0.000000e+00 : f32
    %118 = vector.broadcast %cst_155 : f32 to vector<16x128xf32>
    %119 = arith.maximumf %117, %118 : vector<16x128xf32>
    %c0_156 = arith.constant 0 : index
    %c0_157 = arith.constant 0 : index
    %c0_158 = arith.constant 0 : index
    %120 = vector.load %arg10[%c0_156, %c0_157, %c0_158] : memref<1x16x128xf32, #tpu.memory_space<vmem>>, vector<1x16x128xf32>
    %121 = vector.shape_cast %120 : vector<1x16x128xf32> to vector<16x128xf32>
    %122 = vector.shape_cast %119 : vector<16x128xf32> to vector<1x16x128xf32>
    tpu.vector_store %arg10[%c0_156, %c0_157, %c0_158], %122 {strides = array<i32>} : memref<1x16x128xf32, #tpu.memory_space<vmem>>, vector<1x16x128xf32>,
    return
  }
  func.func @transform_0(%arg0: i32) -> (i32, i32, i32) {
    %c0_i32 = arith.constant 0 : i32
    %c0_i32_0 = arith.constant 0 : i32
    %c0_i32_1 = arith.constant 0 : i32
    return %arg0, %c0_i32, %c0_i32_0 : i32, i32, i32
  }
  func.func @transform_1(%arg0: i32) -> (i32, i32, i32) {
    %c0_i32 = arith.constant 0 : i32
    %c0_i32_0 = arith.constant 0 : i32
    %c0_i32_1 = arith.constant 0 : i32
    return %arg0, %c0_i32, %c0_i32_0 : i32, i32, i32
  }
  func.func @transform_2(%arg0: i32) -> (i32, i32) {
    %c0_i32 = arith.constant 0 : i32
    %c0_i32_0 = arith.constant 0 : i32
    %c0_i32_1 = arith.constant 0 : i32
    return %c0_i32, %c0_i32_0 : i32, i32
  }
  func.func @transform_3(%arg0: i32) -> (i32, i32) {
    %c0_i32 = arith.constant 0 : i32
    %c0_i32_0 = arith.constant 0 : i32
    %c0_i32_1 = arith.constant 0 : i32
    return %c0_i32, %c0_i32_0 : i32, i32
  }
  func.func @transform_4(%arg0: i32) -> (i32, i32) {
    %c0_i32 = arith.constant 0 : i32
    %c0_i32_0 = arith.constant 0 : i32
    %c0_i32_1 = arith.constant 0 : i32
    return %c0_i32, %c0_i32_0 : i32, i32
  }
  func.func @transform_5(%arg0: i32) -> (i32, i32) {
    %c0_i32 = arith.constant 0 : i32
    %c0_i32_0 = arith.constant 0 : i32
    %c0_i32_1 = arith.constant 0 : i32
    return %c0_i32, %c0_i32_0 : i32, i32
  }
  func.func @transform_6(%arg0: i32) -> (i32, i32) {
    %c0_i32 = arith.constant 0 : i32
    %c0_i32_0 = arith.constant 0 : i32
    %c0_i32_1 = arith.constant 0 : i32
    return %c0_i32, %c0_i32_0 : i32, i32
  }
  func.func @transform_7(%arg0: i32) -> (i32, i32) {
    %c0_i32 = arith.constant 0 : i32
    %c0_i32_0 = arith.constant 0 : i32
    %c0_i32_1 = arith.constant 0 : i32
    return %c0_i32, %c0_i32_0 : i32, i32
  }
  func.func @transform_8(%arg0: i32) -> (i32, i32) {
    %c0_i32 = arith.constant 0 : i32
    %c0_i32_0 = arith.constant 0 : i32
    %c0_i32_1 = arith.constant 0 : i32
    return %c0_i32, %c0_i32_0 : i32, i32
  }
  func.func @transform_9(%arg0: i32) -> (i32, i32, i32) {
    %c0_i32 = arith.constant 0 : i32
    %c0_i32_0 = arith.constant 0 : i32
    %c0_i32_1 = arith.constant 0 : i32
    return %arg0, %c0_i32, %c0_i32_0 : i32, i32, i32
  }
}

</mosaic_0001>

<bundles_post_ra>
// kernel: decoder_forward.1
= control target key start
LH: loop header
LB: loop body
LE: loop exit
PB: predicated region body
PF: predicated region fallthrough
CT: control target
= control target key end

     0   :  { %s1586_s30 = smov 0   ;;  %s1915_s0 = inlined_call_operand.vmem [shape: bf16[2,8,384], index: 0, kind: input, shape index: {}]   ;;  %s1916_s1 = inlined_call_operand.vmem [shape: bf16[2,16,384], index: 1, kind: input, shape index: {}]   ;;  %s1917_s2 = inlined_call_operand.vmem [shape: f32[1,128], index: 2, kind: input, shape index: {}]   ;;  %s1918_s3 = inlined_call_operand.vmem [shape: bf16[16,72], index: 3, kind: input, shape index: {}]   ;;  %s1919_s4 = inlined_call_operand.vmem [shape: f32[16,1], index: 4, kind: input, shape index: {}]   ;;  %s1920_s5 = inlined_call_operand.vmem [shape: bf16[16,128], index: 5, kind: input, shape index: {}]   ;;  %s1921_s6 = inlined_call_operand.vmem [shape: f32[16,1], index: 6, kind: input, shape index: {}]   ;;  %s1922_s7 = inlined_call_operand.vmem [shape: bf16[16,64], index: 7, kind: input, shape index: {}]   ;;  %s1923_s8 = inlined_call_operand.vmem [shape: f32[16,1], index: 8, kind: input, shape index: {}]   ;;  %s1924_s9 = inlined_call_operand.vmem [shape: f32[2,16,128], index: 9, kind: output, shape index: {}]  }
   0x1 LB: > { %s1289_s10 = sadd.s32 4294967295, %s1518_s30   ;;  %p1293_p0 = scmp.ge.s32.totalorder %s1518_s30, 1  ;;  %s1518_s30 = sphi %s1586_s30, %s19_s30  }
   0x2   : > { %p297_p1 = scmp.lt.s32.totalorder %s1518_s30, 3 }
   0x4   : > { %p298_p2 = pnand %p1293_p0, %p297_p1 }
   0x5   : > { %p338_p3 = scmp.lt.s32.totalorder (!%p298_p2), %s1289_s10, 1  ;;  %s1520_s19 = smov (!%p298_p2), 108  }
   0x6   : > { %301 = sbr.rel (%p298_p2) target bundleno = 1360 (0x550), region = 56  ;;  %s1521_s20 = smov (!%p298_p2), 106  }
   0x7   : > { %s1522_s21 = smov (!%p298_p2), 107   ;;  %s1523_s22 = smov (!%p298_p2), 116  }
   0x8   : > { %s1524_s23 = smov (!%p298_p2), 117   ;;  %s1525_s24 = smov (!%p298_p2), 126  }
   0x9   : > { %s1526_s25 = smov (!%p298_p2), 118   ;;  %s1527_s26 = smov (!%p298_p2), 127  }
   0xa   : > { %s1529_s27 = smov (!%p298_p2), 11   ;;  %s1533_s16 = smov (!%p298_p2), 1  }
   0xb   : > { %s1926_s10 = smov (!%p338_p3, %s1289_s10), 1  ;;  %v1528_v7 = vmov 0.0   ;;  %vm421_vm0 = vcmask 867328   ;;  %vm409_vm1 = vcmask 883712   ;;  %vm415_vm2 = vcmask 875520   ;;  %v449_v39 = vld [vmem:[%s1919_s4] sm:$0xff] }
   0xc   : > { %s1431_s11 = smul.u32 12, %s1926_s10  ;;  %1385 = vmatprep.subr.bf16.mxu0 %v1528_v7  ;;  %1399 = vmatprep.subr.bf16.mxu1 %v1528_v7  ;;  %vm423_vm3 = vcmask 1043456   ;;  %vm403_vm4 = vcmask 949248   ;;  %vm1530_vm5 = vmmov 0   ;;  %vm381_vm6 = vcmask 1031168   ;;  %v450_v40 = vld [vmem:[%s1919_s4 + $0x8] sm:$0xff] }
   0xd   : > { %s1432_s12 = smul.u32 24, %s1926_s10  ;;  %1395 = vmatprep.mubr.msk.bf16.mxu0 %vm1530_vm5, %v1528_v7  ;;  %1415 = vmatprep.mubr.msk.bf16.mxu1 %vm1530_vm5, %v1528_v7  ;;  %vm387_vm7 = vcmask 965632   ;;  %v1531_v28 = vmov 0   ;;  %vm375_vm8 = vcmask 1039360   ;;  %vm494_vm9 = vcmask 89088   ;;  %v1464_v57 = vld [vmem:[%s1918_s3] sm:$0xff]  }
   0xe   : > { %s342_s15 = scalar_lea.vmem %s1915_s0, %s1431_s11  ;;  %1458 = vset.pattern.permute.xlu0 %v1531_v28  ;;  %355 = vst [vmem:[#allocation2] sm:$0xf] %v1531_v28  ;;  %356 = vst [vmem:[#allocation2 + $0xc] sm:$0xf] %v1531_v28  ;;  %1457 = vset.pattern.permute.xlu1 %v1531_v28  ;;  %vm504_vm10 = vcmask 588800   ;;  %vm704_vm11 = vcmask 1041408  }
   0xf   : > { %s1604_s18 = scalar_lea.vmem %s1916_s1, %s1432_s12  ;;  %v365_v0 = vld [vmem:[%s342_s15 + $0x4] sm:$0xff]  ;;  %357 = vst [vmem:[#allocation2 + $0x8] sm:$0xf] %v1531_v28  ;;  %358 = vst [vmem:[#allocation2 + $0x14] sm:$0xf] %v1531_v28  ;;  %vm680_vm12 = vcmask 973824  }
  0x10   : > { %v1301_v1 = vcombine.low %v365_v0, %v365_v0  ;;  %v1302_v2 = vcombine.high %v365_v0, %v365_v0  ;;  %v363_v3 = vld [vmem:[%s342_s15] sm:$0xff]  ;;  %359 = vst [vmem:[#allocation3] sm:$0xf] %v1531_v28  ;;  %360 = vst [vmem:[#allocation3 + $0xc] sm:$0xf] %v1531_v28  ;;  %vm710_vm13 = vcmask 1045504  }
  0x11   : > { %v1461_v4 = vld [vmem:[%s342_s15 + $0x4] ss:$0 sps:$4 sm:$0xff]   ;;  %v1606_v5 = vcombine.low %v363_v3, %v363_v3  ;;  %v1609_v6 = vcombine.high %v363_v3, %v363_v3  ;;  %361 = vst [vmem:[#allocation3 + $0x8] sm:$0xf] %v1531_v28  ;;  %362 = vst [vmem:[#allocation3 + $0x14] sm:$0xf] %v1531_v28 }
  0x12   : > { %405 = vrot.lane.b32.xlu1 %v1301_v1, %s1520_s19  ;;  %417 = vrot.lane.b32.xlu0 %v1301_v1, %s1521_s20  ;;  %v586_v58 = vld [vmem:[%s1604_s18 + $0xc] sm:$0xcc]  ;;  %s1532_s15 = smov 119   ;;  %v1466_v61 = vld [vmem:[%s1604_s18 + $0x10] ss:$0 sps:$4 sm:$0xcc]  }
  0x13   : > { %v1672_v59 = vcombine.low %v586_v58, %v586_v58  ;;  %v1677_v62 = vcombine.high %v586_v58, %v586_v58  ;;  %v832_v63 = vrot.slane %v1466_v61, 6  ;;  %v572_v58 = vld [vmem:[%s1604_s18 + $0x4] sm:$0x33]  ;;  %vm650_vm14 = vcmask 7168  }
  0x14   : > { %v1736_v61 = vcombine.low %v572_v58, %v572_v58  ;;  %vm632_vm15 = vcmask 957440  }
  0x15   : > { %v800_v60 = vrot.slane %v1672_v59, 2  ;;  %v801_v0 = vrot.slane %v1677_v62, 2 }
  0x16   : > { %407 = vrot.lane.b32.xlu1 %v1302_v2, %s1520_s19  ;;  %419 = vrot.lane.b32.xlu0 %v1302_v2, %s1521_s20  ;;  %s1534_s20 = smov 10  }
  0x1a   : > { %413 = vrot.lane.b32.xlu1 %v1302_v2, %s1522_s21  ;;  %411 = vrot.lane.b32.xlu0 %v1301_v1, %s1522_s21 }
  0x1e   : > { %401 = vrot.lane.b32.xlu1 %v1302_v2, %s1523_s22  ;;  %399 = vrot.lane.b32.xlu0 %v1301_v1, %s1523_s22  ;;  %v1468_v1 = vld [vmem:[%s1604_s18 + $0x10] ss:$0 sps:$4 sm:$0x33]  }
  0x1f   : > { %v584_v2 = vld [vmem:[%s1604_s18 + $0x10] sm:$0x33] }
  0x20   : > { %v1330_v3 = vcombine.high %v584_v2, %v584_v2 }
  0x22   : > { %392 = vrot.lane.b32.xlu0 %v1461_v4, %s1524_s23  ;;  %377 = vrot.lane.b32.xlu1 %v1606_v5, %s1525_s24  ;;  %v1329_v4 = vcombine.low %v584_v2, %v584_v2 }
  0x26   : > { %379 = vrot.lane.b32.xlu0 %v1609_v6, %s1525_s24  ;;  %383 = vrot.lane.b32.xlu1 %v1606_v5, %s1526_s25 }
  0x2a   : > { %385 = vrot.lane.b32.xlu0 %v1609_v6, %s1526_s25  ;;  %371 = vrot.lane.b32.xlu1 %v1606_v5, %s1527_s26 }
  0x2e   : > { %373 = vrot.lane.b32.xlu0 %v1609_v6, %s1527_s26 }
  0x84   : > { %v406_v8 = vpop.permute.xlu1 %405  ;;  %v418_v9 = vpop.permute.xlu0 %417 }
  0x85   : > { %490 = vrot.lane.b32.xlu1 %v418_v9, %s1529_s27 }
  0x88   : > { %v408_v10 = vpop.permute.xlu1 %407  ;;  %v420_v11 = vpop.permute.xlu0 %419 }
  0x89   : > { %v422_v12 = vsel %vm421_vm0, %v418_v9, %v420_v11  ;;  %v410_v15 = vsel %vm409_vm1, %v406_v8, %v408_v10  ;;  %vm915_vm0 = vcmask 80896   ;;  %vm1078_vm1 = vcmask 72704  }
  0x8a   : > { %492 = vrot.lane.b32.xlu0 %v422_v12, %s1529_s27 }
  0x8c   : > { %v414_v13 = vpop.permute.xlu1 %413  ;;  %v412_v14 = vpop.permute.xlu0 %411 }
  0x8d   : > { %v416_v16 = vsel %vm415_vm2, %v412_v14, %v414_v13  ;;  %v443_v17 = vsel %vm423_vm3, %v406_v8, %v412_v14  ;;  %vm1173_vm2 = vcmask 523264  }
  0x8e   : > { %486 = vrot.lane.b32.xlu1 %v443_v17, %s1529_s27  ;;  %v446_v18 = vsel %vm423_vm3, %v410_v15, %v416_v16 }
  0x8f   : > { %488 = vrot.lane.b32.xlu0 %v446_v18, %s1529_s27 }
  0x90   : > { %v402_v19 = vpop.permute.xlu1 %401  ;;  %v400_v20 = vpop.permute.xlu0 %399 }
  0x91   : > { %v404_v21 = vsel %vm403_vm4, %v400_v20, %v402_v19  ;;  %v580_v19 = vld [vmem:[%s1604_s18 + $0xc] sm:$0x33] }
  0x94   : > { %v393_v22 = vpop.permute.xlu0 %392  ;;  %v378_v23 = vpop.permute.xlu1 %377 }
  0x95   : > { %v440_v24 = vsel %vm423_vm3, %v393_v22, %v404_v21  ;;  %v438_v25 = vsel %vm423_vm3, %v393_v22, %v400_v20 }
  0x96   : > { %484 = vrot.lane.b32.xlu0 %v440_v24, %s1529_s27  ;;  %482 = vrot.lane.b32.xlu1 %v438_v25, %s1529_s27  ;;  %v1323_v25 = vcombine.low %v580_v19, %v580_v19 }
  0x98   : > { %v380_v26 = vpop.permute.xlu0 %379  ;;  %v384_v27 = vpop.permute.xlu1 %383 }
  0x99   : > { %v382_v30 = vsel %vm381_vm6, %v378_v23, %v380_v26  ;;  %v1324_v23 = vcombine.high %v580_v19, %v580_v19 }
  0x9c   : > { %v386_v29 = vpop.permute.xlu0 %385  ;;  %v372_v34 = vpop.permute.xlu1 %371 }
  0x9d   : > { %v388_v31 = vsel %vm387_vm7, %v384_v27, %v386_v29  ;;  %v435_v32 = vsel %vm423_vm3, %v380_v26, %v386_v29 }
  0x9e   : > { %480 = vrot.lane.b32.xlu0 %v435_v32, %s1529_s27  ;;  %v432_v33 = vsel %vm423_vm3, %v382_v30, %v388_v31 }
  0x9f   : > { %478 = vrot.lane.b32.xlu1 %v432_v33, %s1529_s27 }
  0xa0   : > { %v374_v35 = vpop.permute.xlu0 %373 }
  0xa1   : > { %v376_v36 = vsel %vm375_vm8, %v372_v34, %v374_v35  ;;  %v429_v37 = vsel %vm423_vm3, %v1609_v6, %v374_v35  ;;  %v1692_v6 = vld [vmem:[%s1917_s2] ss:$0 sm:$0xff]  ;;  %v578_v35 = vld [vmem:[%s1604_s18 + $0x4] sm:$0xcc] }
  0xa2   : > { %476 = vrot.lane.b32.xlu0 %v429_v37, %s1529_s27  ;;  %v426_v38 = vsel %vm423_vm3, %v1606_v5, %v376_v36 }
  0xa3   : > { %474 = vrot.lane.b32.xlu1 %v426_v38, %s1529_s27  ;;  %v1319_v38 = vcombine.low %v578_v35, %v578_v35 }
  0xa6   : > { %453 = vperm.xlu0 %1458, %v449_v39  }
  0xa7   : > { %458 = vperm.xlu1 %1457, %v450_v40  }
  0xaa   : > { %833 = vrot.lane.b32.xlu0 %v832_v63, %s1526_s25 }
  0xab   : > { %819 = vrot.lane.b32.xlu1 %v800_v60, %s1532_s15 }
  0xae   : > { %802 = vrot.lane.b32.xlu0 %v800_v60, %s1533_s16 }
  0xaf   : > { %821 = vrot.lane.b32.xlu1 %v801_v0, %s1532_s15 }
  0xb2   : > { %765 = vrot.lane.b32.xlu0 %v1468_v1, %s1526_s25 }
  0xb3   : > { %804 = vrot.lane.b32.xlu1 %v801_v0, %s1533_s16  ;;  %v1742_v0 = vcombine.high %v572_v58, %v572_v58 }
  0xb6   : > { %778 = vrot.lane.b32.xlu0 %v1329_v4, %s1524_s23 }
  0xb7   : > { %780 = vrot.lane.b32.xlu1 %v1330_v3, %s1524_s23 }
  0xf7   : > { %v491_v41 = vpop.permute.xlu1 %490 }
  0xfc   : > { %v493_v42 = vpop.permute.xlu0 %492 }
  0xfd   : > { %v499_v43 = vsel %vm494_vm9, %v491_v41, %v493_v42  ;;  %v674_v42 = vrot.slane %v1319_v38, 2 }
  0xfe   : > { %v509_v44 = vsel %vm423_vm3, %v499_v43, 0 }
  0xff   : > { %1386 = vmatpush3.bf16.msra.mxu0 %v509_v44 }
 0x100   : > { %v487_v45 = vpop.permute.xlu1 %486  ;;  %1387 = vmatprep.subr.bf16.mxu0 %v1528_v7 }
 0x101   : > { %v489_v46 = vpop.permute.xlu0 %488 }
 0x102   : > { %v498_v47 = vsel %vm494_vm9, %v487_v45, %v489_v46  ;;  %v1320_v45 = vcombine.high %v578_v35, %v578_v35 }
 0x103   : > { %1388 = vmatpush3.bf16.msra.mxu0 %v498_v47 }
 0x104   : > { %1389 = vmatprep.subr.bf16.mxu0 %v1528_v7 }
 0x108   : > { %v485_v48 = vpop.permute.xlu0 %484  ;;  %v483_v49 = vpop.permute.xlu1 %482 }
 0x109   : > { %v497_v50 = vsel %vm494_vm9, %v483_v49, %v485_v48  ;;  %v675_v48 = vrot.slane %v1320_v45, 2  ;;  %v692_v49 = vrot.slane %v1319_v38, 6 }
 0x10a   : > { %1390 = vmatpush3.bf16.msra.mxu0 %v497_v50  ;;  %v574_v50 = vld [vmem:[%s1604_s18] sm:$0xcc] }
 0x10b   : > { %1391 = vmatprep.subr.bf16.mxu0 %v1528_v7 }
 0x110   : > { %v481_v51 = vpop.permute.xlu0 %480 }
 0x111   : > { %v479_v52 = vpop.permute.xlu1 %478 }
 0x112   : > { %v496_v53 = vsel %vm494_vm9, %v479_v52, %v481_v51  ;;  %v1313_v51 = vcombine.low %v574_v50, %v574_v50 }
 0x113   : > { %1392 = vmatpush3.bf16.msra.mxu0 %v496_v53  ;;  %v693_v53 = vrot.slane %v1320_v45, 6 }
 0x114   : > { %v477_v54 = vpop.permute.xlu0 %476  ;;  %1393 = vmatprep.subr.bf16.mxu0 %v1528_v7 }
 0x115   : > { %v475_v55 = vpop.permute.xlu1 %474 }
 0x116   : > { %v495_v56 = vsel %vm494_vm9, %v475_v55, %v477_v54  ;;  %v644_v54 = vrot.slane %v1313_v51, 2 }
 0x117   : > { %1394 = vmatpush3.bf16.msra.mxu0 %v495_v56  ;;  %v1314_v56 = vcombine.high %v574_v50, %v574_v50 }
 0x118   : > { %1419 = vmatprep.subr.bf16.mxu0 %v1528_v7 }
 0x119   : > { %v645_v60 = vrot.slane %v1314_v56, 2 }
 0x11a   : > { %1396 = vmatmul.mubr.msk.bf16.vlgmr.msra.gmra.mxu0 %vm504_vm10, %v1464_v57 }
 0x11b   : > { %1427 = vmatprep.mubr.msk.bf16.mxu0 %vm1530_vm5, %v1528_v7 }
 0x121   : > { %v454_v5 = vpop.permute.xlu0 %453 }
 0x122   : > { %v459_v11 = vpop.permute.xlu1 %458 }
 0x125   : > { %v834_v1 = vpop.permute.xlu0 %833 }
 0x126   : > { %v820_v2 = vpop.permute.xlu1 %819 }
 0x129   : > { %v803_v3 = vpop.permute.xlu0 %802 }
 0x12a   : > { %v822_v4 = vpop.permute.xlu1 %821 }
 0x1da   : > { %v545_v8 = vpop.f32.mrf.mxu0 }
 0x1db   : > { %v546_v9 = vadd.f32 %v545_v8, %v454_v5  ;;  %v766_v5 = vpop.permute.xlu0 %765  ;;  %v805_v8 = vpop.permute.xlu1 %804 }
 0x1dc   : > { %v1397_v10 = vpop.f32.mrf.mxu0 }
 0x1dd   : > { %v558_v12 = vmul.f32 %v1692_v6, %v546_v9 }
 0x1de   : > { %v548_v13 = vpop.f32.mrf.mxu0 }
 0x1df   : > { %v1361_v14 = vpack.c.bf16 %v558_v12, %v558_v12  ;;  %v549_v15 = vadd.f32 %v548_v13, %v459_v11  ;;  %v779_v9 = vpop.permute.xlu0 %778  ;;  %v781_v10 = vpop.permute.xlu1 %780 }
 0x1e0   : > { %v1398_v16 = vpop.f32.mrf.mxu0 }
 0x1e1   : > { %568 = vst [vmem:[#allocation2 + $0x4] sm:$0xf] %v1361_v14  ;;  %v559_v17 = vmul.f32 %v1692_v6, %v549_v15  ;;  %v817_v14 = vrot.slane %v1672_v59, 6  ;;  %v823_v16 = vsel %vm680_vm12, %v820_v2, %v822_v4 }
 0x1e3   : > { %v1362_v18 = vpack.c.bf16 %v559_v17, %v559_v17 }
 0x1e5   : > { %569 = vst [vmem:[#allocation2 + $0x10] sm:$0xf] %v1362_v18 }
 0x1e8   : > { %v579_v44 = vld [vmem:[#allocation2 + $0x4] sm:$0xcc] }
 0x1e9   : > { %v1321_v47 = vcombine.low %v579_v44, %v579_v44  ;;  %v1322_v52 = vcombine.high %v579_v44, %v579_v44  ;;  %v575_v55 = vld [vmem:[#allocation2] sm:$0xcc] }
 0x1ea   : > { %v1315_v57 = vcombine.low %v575_v55, %v575_v55  ;;  %v1316_v63 = vcombine.high %v575_v55, %v575_v55 }
 0x1ec   : > { %v587_v20 = vld [vmem:[#allocation2 + $0xc] sm:$0xcc]  ;;  %v581_v24 = vld [vmem:[#allocation2 + $0xc] sm:$0x33] }
 0x1ed   : > { %v1697_v21 = vcombine.high %v587_v20, %v587_v20  ;;  %v1699_v22 = vcombine.low %v587_v20, %v587_v20  ;;  %v1325_v26 = vcombine.low %v581_v24, %v581_v24  ;;  %v1326_v27 = vcombine.high %v581_v24, %v581_v24  ;;  %v1473_v28 = vld [vmem:[#allocation2 + $0x10] ss:$0 sps:$4 sm:$0xcc]  }
 0x1ee   : > { %v585_v31 = vld [vmem:[#allocation2 + $0x10] sm:$0x33] }
 0x1ef   : > { %826 = vrot.lane.b32.xlu1 %v1697_v21, %s1532_s15  ;;  %824 = vrot.lane.b32.xlu0 %v1699_v22, %s1532_s15  ;;  %v748_v29 = vrot.slane %v1325_v26, 6  ;;  %v749_v30 = vrot.slane %v1326_v27, 6  ;;  %v1331_v34 = vcombine.low %v585_v31, %v585_v31  ;;  %v1477_v37 = vld [vmem:[#allocation2 + $0x10] ss:$0 sps:$4 sm:$0x33]   ;;  %v755_v40 = vrot.slane %v1325_v26, 2 }
 0x1f0   : > { %v770_v39 = vrot.slane %v1477_v37, 6  ;;  %v1332_v41 = vcombine.high %v585_v31, %v585_v31  ;;  %v756_v46 = vrot.slane %v1326_v27, 2  ;;  %v818_v37 = vrot.slane %v1677_v62, 6 }
 0x1f1   : > { %v1709_v32 = vsel %vm704_vm11, %v1324_v23, %v749_v30  ;;  %v1712_v33 = vsel %vm704_vm11, %v1323_v25, %v748_v29  ;;  %v788_v36 = vrot.slane %v1331_v34, 2 }
 0x1f2   : > { %v789_v43 = vrot.slane %v1332_v41, 2 }
 0x1f3   : > { %838 = vrot.lane.b32.xlu1 %v1473_v28, %s1526_s25  ;;  %812 = vrot.lane.b32.xlu0 %v1699_v22, %s1533_s16 }
 0x1f7   : > { %752 = vrot.lane.b32.xlu1 %v1324_v23, %s1527_s26  ;;  %750 = vrot.lane.b32.xlu0 %v1323_v25, %s1527_s26 }
 0x1fb   : > { %814 = vrot.lane.b32.xlu1 %v1697_v21, %s1533_s16  ;;  %790 = vrot.lane.b32.xlu0 %v788_v36, %s1524_s23 }
 0x1ff   : > { %771 = vrot.lane.b32.xlu1 %v770_v39, %s1526_s25  ;;  %757 = vrot.lane.b32.xlu0 %v755_v40, %s1527_s26 }
 0x203   : > { %792 = vrot.lane.b32.xlu1 %v789_v43, %s1524_s23  ;;  %676 = vrot.lane.b32.xlu0 %v674_v42, %s1532_s15 }
 0x207   : > { %759 = vrot.lane.b32.xlu1 %v756_v46, %s1527_s26  ;;  %687 = vrot.lane.b32.xlu0 %v1321_v47, %s1532_s15 }
 0x20b   : > { %678 = vrot.lane.b32.xlu1 %v675_v48, %s1532_s15  ;;  %694 = vrot.lane.b32.xlu0 %v692_v49, %s1526_s25  ;;  %v573_v48 = vld [vmem:[#allocation2 + $0x4] sm:$0x33] }
 0x20c   : > { %v1311_v50 = vcombine.low %v573_v48, %v573_v48 }
 0x20e   : > { %v621_v56 = vrot.slane %v1311_v50, 6 }
 0x20f   : > { %689 = vrot.lane.b32.xlu1 %v1322_v52, %s1532_s15  ;;  %699 = vrot.lane.b32.xlu0 %v1321_v47, %s1526_s25 }
 0x213   : > { %696 = vrot.lane.b32.xlu1 %v693_v53, %s1526_s25  ;;  %646 = vrot.lane.b32.xlu0 %v644_v54, %s1533_s16  ;;  %v1312_v54 = vcombine.high %v573_v48, %v573_v48 }
 0x215   : > { %v610_v58 = vrot.slane %v1312_v54, 2 }
 0x217   : > { %701 = vrot.lane.b32.xlu1 %v1322_v52, %s1526_s25  ;;  %657 = vrot.lane.b32.xlu0 %v1315_v57, %s1533_s16  ;;  %v782_v52 = vsel %vm632_vm15, %v779_v9, %v781_v10  ;;  %v609_v57 = vrot.slane %v1311_v50, 2 }
 0x21b   : > { %648 = vrot.lane.b32.xlu1 %v645_v60, %s1533_s16  ;;  %616 = vrot.lane.b32.xlu0 %v1736_v61, %s1526_s25  ;;  %v927_v60 = vld [vmem:[%s1921_s6 + $0x8] sm:$0xff] }
 0x21f   : > { %659 = vrot.lane.b32.xlu1 %v1316_v63, %s1533_s16  ;;  %v926_v63 = vld [vmem:[%s1921_s6] sm:$0xff] }
 0x223   : > { %618 = vrot.lane.b32.xlu1 %v1742_v0, %s1526_s25 }
 0x261   : > { %v825_v11 = vpop.permute.xlu0 %824  ;;  %v827_v12 = vpop.permute.xlu1 %826 }
 0x262   : > { %v884_v13 = vsel %vm704_vm11, %v822_v4, %v827_v12  ;;  %v828_v15 = vsel %vm680_vm12, %v825_v11, %v827_v12 }
 0x263   : > { %v887_v19 = vsel %vm423_vm3, %v884_v13, %v834_v1  ;;  %v881_v20 = vsel %vm704_vm11, %v823_v16, %v828_v15 }
 0x264   : > { %v886_v27 = vsel %vm423_vm3, %v881_v20, %v834_v1 }
 0x265   : > { %v813_v17 = vpop.permute.xlu0 %812  ;;  %v839_v18 = vpop.permute.xlu1 %838 }
 0x266   : > { %v867_v23 = vsel %vm704_vm11, %v803_v3, %v813_v17  ;;  %v890_v24 = vsel %vm710_vm13, %v887_v19, %v839_v18  ;;  %v889_v28 = vsel %vm710_vm13, %v886_v27, %v839_v18 }
 0x267   : > { %913 = vrot.lane.b32.xlu1 %v890_v24, %s1534_s20  ;;  %v872_v59 = vsel %vm423_vm3, %v867_v23, %v817_v14 }
 0x268   : > { %v876_v25 = vsel %vm710_vm13, %v872_v59, %v1699_v22  ;;  %v806_v22 = vsel %vm650_vm14, %v803_v3, %v805_v8 }
 0x269   : > { %907 = vrot.lane.b32.xlu0 %v876_v25, %s1534_s20  ;;  %v753_v26 = vpop.permute.xlu1 %752  ;;  %v751_v29 = vpop.permute.xlu0 %750 }
 0x26a   : > { %v754_v38 = vsel %vm375_vm8, %v751_v29, %v753_v26  ;;  %v849_v40 = vsel %vm423_vm3, %v1709_v32, %v753_v26 }
 0x26b   : > { %v847_v62 = vsel %vm423_vm3, %v1712_v33, %v754_v38 }
 0x26d   : > { %911 = vrot.lane.b32.xlu0 %v889_v28, %s1534_s20  ;;  %v815_v30 = vpop.permute.xlu1 %814  ;;  %v791_v34 = vpop.permute.xlu0 %790  ;;  %v1493_v28 = vld [vmem:[%s1604_s18 + $0x4] ss:$0 sps:$4 sm:$0xcc]  }
 0x26e   : > { %v816_v35 = vsel %vm650_vm14, %v813_v17, %v815_v30 }
 0x26f   : > { %v870_v39 = vsel %vm704_vm11, %v806_v22, %v816_v35 }
 0x270   : > { %v874_v47 = vsel %vm423_vm3, %v870_v39, %v818_v37  ;;  %v665_v39 = vrot.slane %v1493_v28, 6 }
 0x271   : > { %v772_v31 = vpop.permute.xlu1 %771  ;;  %v758_v41 = vpop.permute.xlu0 %757  ;;  %v878_v49 = vsel %vm710_vm13, %v874_v47, %v1697_v21  ;;  %v622_v21 = vrot.slane %v1312_v54, 6 }
 0x272   : > { %v856_v42 = vsel %vm704_vm11, %v766_v5, %v772_v31 }
 0x273   : > { %v858_v32 = vsel %vm423_vm3, %v856_v42, %v779_v9  ;;  %v860_v53 = vsel %vm423_vm3, %v856_v42, %v782_v52 }
 0x274   : > { %v862_v33 = vsel %vm710_vm13, %v858_v32, %v791_v34  ;;  %v1495_v32 = vld [vmem:[#allocation2 + $0x4] ss:$0 sps:$4 sm:$0x33]  }
 0x275   : > { %v793_v36 = vpop.permute.xlu1 %792  ;;  %v677_v1 = vpop.permute.xlu0 %676 }
 0x276   : > { %v794_v51 = vsel %vm632_vm15, %v791_v34, %v793_v36 }
 0x277   : > { %v864_v55 = vsel %vm710_vm13, %v860_v53, %v794_v51 }
 0x279   : > { %v760_v43 = vpop.permute.xlu1 %759 }
 0x27a   : > { %v761_v44 = vsel %vm375_vm8, %v758_v41, %v760_v43  ;;  %v853_v45 = vsel %vm710_vm13, %v849_v40, %v760_v43 }
 0x27b   : > { %901 = vrot.lane.b32.xlu1 %v853_v45, %s1534_s20  ;;  %v851_v46 = vsel %vm710_vm13, %v847_v62, %v761_v44 }
 0x27c   : > { %899 = vrot.lane.b32.xlu0 %v851_v46, %s1534_s20  ;;  %v1494_v46 = vld [vmem:[#allocation2 + $0x4] ss:$0 sps:$4 sm:$0xcc]  }
 0x27d   : > { %v679_v2 = vpop.permute.xlu1 %678 }
 0x27e   : > { %v681_v29 = vsel %vm680_vm12, %v677_v1, %v679_v2 }
 0x27f   : > { %909 = vrot.lane.b32.xlu1 %v878_v49, %s1534_s20 }
 0x280   : > { %903 = vrot.lane.b32.xlu0 %v862_v33, %s1534_s20 }
 0x281   : > { %v690_v3 = vpop.permute.xlu1 %689 }
 0x283   : > { %905 = vrot.lane.b32.xlu1 %v864_v55, %s1534_s20 }
 0x284   : > { %623 = vrot.lane.b32.xlu0 %v621_v56, %s1526_s25  ;;  %v593_v56 = vrot.slane %v1495_v32, 6 }
 0x287   : > { %625 = vrot.lane.b32.xlu1 %v622_v21, %s1526_s25 }
 0x288   : > { %628 = vrot.lane.b32.xlu0 %v1736_v61, %s1524_s23 }
 0x28b   : > { %630 = vrot.lane.b32.xlu1 %v1742_v0, %s1524_s23 }
 0x28c   : > { %634 = vrot.lane.b32.xlu0 %v609_v57, %s1524_s23 }
 0x28f   : > { %636 = vrot.lane.b32.xlu1 %v610_v58, %s1524_s23 }
 0x290   : > { %599 = vrot.lane.b32.xlu0 %v1736_v61, %s1527_s26  ;;  %v688_v61 = vpop.permute.xlu0 %687 }
 0x291   : > { %v691_v30 = vsel %vm680_vm12, %v688_v61, %v690_v3 }
 0x292   : > { %v732_v40 = vsel %vm704_vm11, %v681_v29, %v691_v30 }
 0x293   : > { %601 = vrot.lane.b32.xlu1 %v1742_v0, %s1527_s26  ;;  %v697_v0 = vpop.permute.xlu1 %696 }
 0x294   : > { %611 = vrot.lane.b32.xlu0 %v609_v57, %s1527_s26  ;;  %v695_v4 = vpop.permute.xlu0 %694  ;;  %v570_v57 = vld [vmem:[%s1604_s18 + $0x4] sm:$0x3]  ;;  %s1535_s18 = smov 9  }
 0x295   : > { %v698_v36 = vsel %vm387_vm7, %v695_v4, %v697_v0  ;;  %v707_v1 = vsel %vm704_vm11, %v570_v57, %v593_v56  ;;  %v1496_v4 = vld [vmem:[%s1920_s5] sm:$0xff]  }
 0x296   : > { %v734_v43 = vsel %vm423_vm3, %v732_v40, %v698_v36 }
 0x297   : > { %613 = vrot.lane.b32.xlu1 %v610_v58, %s1527_s26  ;;  %v702_v8 = vpop.permute.xlu1 %701 }
 0x298   : > { %935 = vperm.xlu0 %1458, %v927_v60   ;;  %v700_v5 = vpop.permute.xlu0 %699 }
 0x299   : > { %v703_v38 = vsel %vm387_vm7, %v700_v5, %v702_v8 }
 0x29a   : > { %v736_v45 = vsel %vm710_vm13, %v734_v43, %v703_v38 }
 0x29b   : > { %930 = vperm.xlu1 %1457, %v926_v63   ;;  %v649_v10 = vpop.permute.xlu1 %648 }
 0x29c   : > { %v647_v9 = vpop.permute.xlu0 %646 }
 0x29d   : > { %v651_v31 = vsel %vm650_vm14, %v647_v9, %v649_v10 }
 0x29f   : > { %v660_v12 = vpop.permute.xlu1 %659 }
 0x2a0   : > { %v658_v11 = vpop.permute.xlu0 %657 }
 0x2a1   : > { %v661_v34 = vsel %vm650_vm14, %v658_v11, %v660_v12 }
 0x2a2   : > { %v724_v41 = vsel %vm704_vm11, %v651_v31, %v661_v34 }
 0x2a3   : > { %v619_v14 = vpop.permute.xlu1 %618  ;;  %v726_v62 = vsel %vm423_vm3, %v724_v41, %v665_v39 }
 0x2a4   : > { %v617_v13 = vpop.permute.xlu0 %616  ;;  %v728_v50 = vsel %vm710_vm13, %v726_v62, %v1494_v46 }
 0x2a5   : > { %v620_v51 = vsel %vm387_vm7, %v617_v13, %v619_v14 }
 0x2d9   : > { %v914_v16 = vpop.permute.xlu1 %913 }
 0x2db   : > { %v908_v15 = vpop.permute.xlu0 %907 }
 0x2df   : > { %v912_v17 = vpop.permute.xlu0 %911 }
 0x2e0   : > { %v919_v18 = vsel %vm915_vm0, %v912_v17, %v914_v16 }
 0x2e1   : > { %1400 = vmatpush3.bf16.msra.mxu1 %v919_v18 }
 0x2e2   : > { %1401 = vmatprep.subr.bf16.mxu1 %v1528_v7 }
 0x2ed   : > { %v902_v19 = vpop.permute.xlu1 %901 }
 0x2ee   : > { %v900_v20 = vpop.permute.xlu0 %899 }
 0x2ef   : > { %v916_v22 = vsel %vm915_vm0, %v900_v20, %v902_v19 }
 0x2f1   : > { %v910_v23 = vpop.permute.xlu1 %909 }
 0x2f2   : > { %v904_v24 = vpop.permute.xlu0 %903  ;;  %v918_v59 = vsel %vm915_vm0, %v908_v15, %v910_v23 }
 0x2f3   : > { %1402 = vmatpush3.bf16.msra.mxu1 %v918_v59 }
 0x2f4   : > { %1403 = vmatprep.subr.bf16.mxu1 %v1528_v7 }
 0x2f5   : > { %v906_v25 = vpop.permute.xlu1 %905 }
 0x2f6   : > { %v624_v26 = vpop.permute.xlu0 %623  ;;  %v917_v27 = vsel %vm915_vm0, %v904_v24, %v906_v25 }
 0x2f7   : > { %1404 = vmatpush3.bf16.msra.mxu1 %v917_v27 }
 0x2f8   : > { %1405 = vmatprep.subr.bf16.mxu1 %v1528_v7 }
 0x2f9   : > { %v626_v35 = vpop.permute.xlu1 %625 }
 0x2fa   : > { %v629_v37 = vpop.permute.xlu0 %628  ;;  %v627_v47 = vsel %vm387_vm7, %v624_v26, %v626_v35 }
 0x2fb   : > { %1406 = vmatpush3.bf16.msra.mxu1 %v916_v22  ;;  %v716_v53 = vsel %vm704_vm11, %v620_v51, %v627_v47 }
 0x2fc   : > { %1407 = vmatprep.subr.bf16.mxu1 %v1528_v7 }
 0x2fd   : > { %v631_v42 = vpop.permute.xlu1 %630 }
 0x2fe   : > { %v635_v44 = vpop.permute.xlu0 %634  ;;  %v633_v49 = vsel %vm632_vm15, %v629_v37, %v631_v42 }
 0x2ff   : > { %1408 = vmatpush3.bf16.msra.mxu1 %v736_v45  ;;  %v718_v55 = vsel %vm423_vm3, %v716_v53, %v633_v49  ;;  %v1156_v53 = vld [vmem:[%s1923_s8] sm:$0xff] }
 0x300   : > { %1409 = vmatprep.subr.bf16.mxu1 %v1528_v7 }
 0x301   : > { %v637_v48 = vpop.permute.xlu1 %636 }
 0x302   : > { %v638_v33 = vsel %vm632_vm15, %v635_v44, %v637_v48  ;;  %v600_v52 = vpop.permute.xlu0 %599 }
 0x303   : > { %1410 = vmatpush3.bf16.msra.mxu1 %v728_v50  ;;  %v720_v21 = vsel %vm710_vm13, %v718_v55, %v638_v33 }
 0x304   : > { %1411 = vmatprep.subr.bf16.mxu1 %v1528_v7 }
 0x305   : > { %v602_v54 = vpop.permute.xlu1 %601 }
 0x306   : > { %v603_v58 = vsel %vm375_vm8, %v600_v52, %v602_v54  ;;  %v612_v60 = vpop.permute.xlu0 %611  ;;  %v1157_v52 = vld [vmem:[%s1923_s8 + $0x8] sm:$0xff] }
 0x307   : > { %1412 = vmatpush3.bf16.msra.mxu1 %v720_v21  ;;  %v709_v61 = vsel %vm423_vm3, %v707_v1, %v603_v58 }
 0x308   : > { %1413 = vmatprep.subr.bf16.mxu1 %v1528_v7 }
 0x309   : > { %v614_v63 = vpop.permute.xlu1 %613 }
 0x30a   : > { %v615_v2 = vsel %vm375_vm8, %v612_v60, %v614_v63 }
 0x30b   : > { %v712_v3 = vsel %vm710_vm13, %v709_v61, %v615_v2 }
 0x30c   : > { %1414 = vmatpush3.bf16.msra.mxu1 %v712_v3 }
 0x30f   : > { %1416 = vmatmul.mubr.bf16.vlgmr.msra.gmra.mxu1 %v1496_v4 }
 0x313   : > { %v936_v11 = vpop.permute.xlu0 %935 }
 0x316   : > { %v931_v0 = vpop.permute.xlu1 %930 }
 0x3cf   : > { %v978_v5 = vpop.f32.mrf.mxu1 }
 0x3d0   : > { %v979_v8 = vadd.f32 %v978_v5, %v931_v0 }
 0x3d1   : > { %v1417_v9 = vpop.f32.mrf.mxu1 }
 0x3d2   : > { %v985_v10 = vmax.f32 %v979_v8, 0.0 }
 0x3d3   : > { %v981_v12 = vpop.f32.mrf.mxu1 }
 0x3d4   : > { %v987_v13 = vmul.f32 %v1692_v6, %v985_v10  ;;  %v982_v14 = vadd.f32 %v981_v12, %v936_v11 }
 0x3d5   : > { %v1418_v15 = vpop.f32.mrf.mxu1 }
 0x3d6   : > { %v1363_v16 = vpack.c.bf16 %v987_v13, %v987_v13  ;;  %v986_v17 = vmax.f32 %v982_v14, 0.0 }
 0x3d8   : > { %997 = vst [vmem:[#allocation3 + $0x4] sm:$0xf] %v1363_v16  ;;  %v988_v18 = vmul.f32 %v1692_v6, %v986_v17 }
 0x3da   : > { %v1364_v19 = vpack.c.bf16 %v988_v18, %v988_v18 }
 0x3dc   : > { %998 = vst [vmem:[#allocation3 + $0x10] sm:$0xf] %v1364_v19 }
 0x3df   : > { %v1003_v20 = vld [vmem:[#allocation3 + $0x4] sm:$0xcc]  ;;  %v1000_v29 = vld [vmem:[#allocation3 + $0x4] sm:$0x33] }
 0x3e0   : > { %v1001_v23 = vld [vmem:[#allocation3] sm:$0xcc]  ;;  %v1347_v24 = vcombine.high %v1003_v20, %v1003_v20  ;;  %v1346_v59 = vcombine.low %v1003_v20, %v1003_v20  ;;  %v1343_v31 = vcombine.high %v1000_v29, %v1000_v29  ;;  %v1342_v34 = vcombine.low %v1000_v29, %v1000_v29 }
 0x3e1   : > { %v1345_v25 = vcombine.high %v1001_v23, %v1001_v23  ;;  %v1344_v26 = vcombine.low %v1001_v23, %v1001_v23 }
 0x3e2   : > { %1059 = vrot.lane.b32.xlu1 %v1347_v24, %s1526_s25  ;;  %1057 = vrot.lane.b32.xlu0 %v1346_v59, %s1526_s25  ;;  %v1051_v6 = vrot.slane %v1347_v24, 6  ;;  %v1050_v30 = vrot.slane %v1346_v59, 6  ;;  %v1015_v35 = vrot.slane %v1343_v31, 6  ;;  %v1014_v36 = vrot.slane %v1342_v34, 6 }
 0x3e3   : > { %v1039_v27 = vrot.slane %v1345_v25, 2  ;;  %v1038_v28 = vrot.slane %v1344_v26, 2  ;;  %v1007_v37 = vld [vmem:[#allocation3 + $0xc] sm:$0xcc]  ;;  %v1004_v39 = vld [vmem:[#allocation3 + $0xc] sm:$0x33] }
 0x3e4   : > { %v1354_v22 = vcombine.high %v1007_v37, %v1007_v37  ;;  %v1353_v38 = vcombine.low %v1007_v37, %v1007_v37  ;;  %v1349_v40 = vcombine.high %v1004_v39, %v1004_v39  ;;  %v1348_v41 = vcombine.low %v1004_v39, %v1004_v39  ;;  %v1006_v62 = vld [vmem:[#allocation3 + $0x10] sm:$0x33]  ;;  %v999_v39 = vld [vmem:[#allocation3 + $0x4] sm:$0x3] }
 0x3e5   : > { %v1352_v48 = vcombine.high %v1006_v62, %v1006_v62  ;;  %v1351_v32 = vcombine.low %v1006_v62, %v1006_v62  ;;  %v1027_v51 = vrot.slane %v1343_v31, 2  ;;  %v1026_v33 = vrot.slane %v1342_v34, 2  ;;  %v1509_v13 = vld [vmem:[#allocation3 + $0x10] ss:$0 sps:$4 sm:$0xcc]   ;;  %v1511_v62 = vld [vmem:[%s1922_s7] sm:$0xff]  }
 0x3e6   : > { %1042 = vrot.lane.b32.xlu1 %v1039_v27, %s1533_s16  ;;  %1040 = vrot.lane.b32.xlu0 %v1038_v28, %s1533_s16  ;;  %v1101_v42 = vrot.slane %v1354_v22, 2  ;;  %v1100_v43 = vrot.slane %v1353_v38, 2  ;;  %v1113_v44 = vrot.slane %v1354_v22, 6  ;;  %v1112_v45 = vrot.slane %v1353_v38, 6  ;;  %v1002_v27 = vld [vmem:[#allocation3 + $0x4] sm:$0xc] }
 0x3e7   : > { %v1073_v46 = vrot.slane %v1349_v40, 6  ;;  %v1072_v47 = vrot.slane %v1348_v41, 6  ;;  %v1089_v49 = vrot.slane %v1352_v48, 2  ;;  %v1088_v50 = vrot.slane %v1351_v32, 2 }
 0x3e8   : > { %v1510_v24 = vld [vmem:[#allocation3 + $0x10] ss:$0 sps:$4 sm:$0x33]  }
 0x3ea   : > { %1054 = vrot.lane.b32.xlu1 %v1051_v6, %s1532_s15  ;;  %1052 = vrot.lane.b32.xlu0 %v1050_v30, %s1532_s15 }
 0x3ee   : > { %1018 = vrot.lane.b32.xlu1 %v1015_v35, %s1527_s26  ;;  %1016 = vrot.lane.b32.xlu0 %v1014_v36, %s1527_s26 }
 0x3f2   : > { %1109 = vrot.lane.b32.xlu1 %v1354_v22, %s1534_s20  ;;  %1107 = vrot.lane.b32.xlu0 %v1353_v38, %s1534_s20 }
 0x3f6   : > { %1069 = vrot.lane.b32.xlu1 %v1349_v40, %s1534_s20  ;;  %1067 = vrot.lane.b32.xlu0 %v1348_v41, %s1534_s20 }
 0x3fa   : > { %1104 = vrot.lane.b32.xlu1 %v1101_v42, %s1529_s27  ;;  %1102 = vrot.lane.b32.xlu0 %v1100_v43, %s1529_s27 }
 0x3fe   : > { %1116 = vrot.lane.b32.xlu1 %v1113_v44, %s1533_s16  ;;  %1114 = vrot.lane.b32.xlu0 %v1112_v45, %s1533_s16 }
 0x402   : > { %1076 = vrot.lane.b32.xlu1 %v1073_v46, %s1535_s18  ;;  %1074 = vrot.lane.b32.xlu0 %v1072_v47, %s1535_s18 }
 0x406   : > { %1092 = vrot.lane.b32.xlu1 %v1089_v49, %s1527_s26  ;;  %1090 = vrot.lane.b32.xlu0 %v1088_v50, %s1527_s26  ;;  %s1360_s26 = sshll.u32 %s1926_s10, 4 }
 0x407   : > { %s352_s17 = scalar_lea.vmem %s1924_s9, %s1360_s26 }
 0x40a   : > { %1023 = vrot.lane.b32.xlu1 %v1343_v31, %s1526_s25  ;;  %1021 = vrot.lane.b32.xlu0 %v1342_v34, %s1526_s25 }
 0x40e   : > { %1030 = vrot.lane.b32.xlu1 %v1027_v51, %s1524_s23  ;;  %1028 = vrot.lane.b32.xlu0 %v1026_v33, %s1524_s23 }
 0x412   : > { %1165 = vperm.xlu1 %1457, %v1157_v52   ;;  %1160 = vperm.xlu0 %1458, %v1156_v53  }
 0x454   : > { %v1060_v54 = vpop.permute.xlu1 %1059  ;;  %v1058_v55 = vpop.permute.xlu0 %1057 }
 0x455   : > { %v1061_v36 = vsel %vm387_vm7, %v1058_v55, %v1060_v54 }
 0x458   : > { %v1043_v56 = vpop.permute.xlu1 %1042  ;;  %v1041_v21 = vpop.permute.xlu0 %1040 }
 0x459   : > { %v1044_v23 = vsel %vm650_vm14, %v1041_v21, %v1043_v56 }
 0x45a   : > { %v1132_v6 = vsel %vm704_vm11, %v1044_v23, %v1002_v27 }
 0x45c   : > { %v1055_v57 = vpop.permute.xlu1 %1054  ;;  %v1053_v58 = vpop.permute.xlu0 %1052 }
 0x45d   : > { %v1056_v59 = vsel %vm680_vm12, %v1053_v58, %v1055_v57 }
 0x45e   : > { %v1134_v31 = vsel %vm423_vm3, %v1132_v6, %v1056_v59 }
 0x45f   : > { %v1136_v38 = vsel %vm710_vm13, %v1134_v31, %v1061_v36 }
 0x460   : > { %v1019_v60 = vpop.permute.xlu1 %1018  ;;  %v1017_v63 = vpop.permute.xlu0 %1016 }
 0x461   : > { %v1020_v37 = vsel %vm375_vm8, %v1017_v63, %v1019_v60 }
 0x462   : > { %v1124_v40 = vsel %vm704_vm11, %v999_v39, %v1020_v37 }
 0x464   : > { %v1110_v1 = vpop.permute.xlu1 %1109  ;;  %v1108_v2 = vpop.permute.xlu0 %1107 }
 0x465   : > { %v1111_v8 = vsel %vm915_vm0, %v1108_v2, %v1110_v1 }
 0x468   : > { %v1070_v61 = vpop.permute.xlu1 %1069  ;;  %v1068_v3 = vpop.permute.xlu0 %1067 }
 0x469   : > { %v1071_v18 = vsel %vm915_vm0, %v1068_v3, %v1070_v61 }
 0x46c   : > { %v1105_v4 = vpop.permute.xlu1 %1104  ;;  %v1103_v0 = vpop.permute.xlu0 %1102 }
 0x46d   : > { %v1106_v5 = vsel %vm494_vm9, %v1103_v0, %v1105_v4 }
 0x46e   : > { %v1148_v11 = vsel %vm704_vm11, %v1106_v5, %v1111_v8 }
 0x470   : > { %v1117_v9 = vpop.permute.xlu1 %1116  ;;  %v1115_v10 = vpop.permute.xlu0 %1114 }
 0x471   : > { %v1118_v12 = vsel %vm650_vm14, %v1115_v10, %v1117_v9 }
 0x472   : > { %v1150_v14 = vsel %vm423_vm3, %v1148_v11, %v1118_v12 }
 0x473   : > { %v1152_v15 = vsel %vm710_vm13, %v1150_v14, %v1509_v13 }
 0x474   : > { %v1077_v16 = vpop.permute.xlu1 %1076  ;;  %1420 = vmatpush3.bf16.msra.mxu0 %v1152_v15  ;;  %v1075_v17 = vpop.permute.xlu0 %1074 }
 0x475   : > { %v1079_v19 = vsel %vm1078_vm1, %v1075_v17, %v1077_v16  ;;  %1421 = vmatprep.subr.bf16.mxu0 %v1528_v7 }
 0x476   : > { %v1140_v20 = vsel %vm704_vm11, %v1071_v18, %v1079_v19 }
 0x477   : > { %v1142_v29 = vsel %vm423_vm3, %v1140_v20, %v1510_v24 }
 0x478   : > { %v1093_v25 = vpop.permute.xlu1 %1092  ;;  %v1091_v26 = vpop.permute.xlu0 %1090 }
 0x479   : > { %v1094_v28 = vsel %vm375_vm8, %v1091_v26, %v1093_v25 }
 0x47a   : > { %v1144_v30 = vsel %vm710_vm13, %v1142_v29, %v1094_v28 }
 0x47b   : > { %1422 = vmatpush3.bf16.msra.mxu0 %v1144_v30 }
 0x47c   : > { %v1024_v34 = vpop.permute.xlu1 %1023  ;;  %v1022_v35 = vpop.permute.xlu0 %1021  ;;  %1423 = vmatprep.subr.bf16.mxu0 %v1528_v7 }
 0x47d   : > { %v1025_v22 = vsel %vm387_vm7, %v1022_v35, %v1024_v34 }
 0x47e   : > { %v1126_v43 = vsel %vm423_vm3, %v1124_v40, %v1025_v22 }
 0x47f   : > { %1424 = vmatpush3.bf16.msra.mxu0 %v1136_v38 }
 0x480   : > { %v1031_v41 = vpop.permute.xlu1 %1030  ;;  %v1029_v42 = vpop.permute.xlu0 %1028  ;;  %1425 = vmatprep.subr.bf16.mxu0 %v1528_v7 }
 0x481   : > { %v1032_v44 = vsel %vm632_vm15, %v1029_v42, %v1031_v41 }
 0x482   : > { %v1128_v45 = vsel %vm710_vm13, %v1126_v43, %v1032_v44 }
 0x483   : > { %1426 = vmatpush3.bf16.msra.mxu0 %v1128_v45 }
 0x486   : > { %1428 = vmatmul.mubr.msk.bf16.vlgmr.msra.gmra.mxu0 %vm1173_vm2, %v1511_v62 }
 0x48d   : > { %v1161_v46 = vpop.permute.xlu0 %1160  ;;  %v1166_v49 = vpop.permute.xlu1 %1165 }
 0x546   : > { %v1211_v47 = vpop.f32.mrf.mxu0 }
 0x547   : > { %v1212_v48 = vadd.f32 %v1211_v47, %v1161_v46 }
 0x548   : > { %v1429_v7 = vpop.f32.mrf.mxu0 }
 0x549   : > { %v1218_v32 = vmax.f32 %v1212_v48, 0.0 }
 0x54a   : > { %v1214_v50 = vpop.f32.mrf.mxu0 }
 0x54b   : > { %1220 = vst [vmem:[%s352_s17] sm:$0xff] %v1218_v32  ;;  %v1215_v51 = vadd.f32 %v1214_v50, %v1166_v49 }
 0x54c   : > { %v1430_v33 = vpop.f32.mrf.mxu0 }
 0x54d   : > { %v1219_v52 = vmax.f32 %v1215_v51, 0.0 }
 0x54f   : > { %1221 = vst [vmem:[%s352_s17 + $0x8] sm:$0xff] %v1219_v52 }
 0x550 PF: > { %s19_s30 = sadd.s32 1, %s1518_s30  }
 0x551   : > { %p16_p4 = scmp.ge.s32.totalorder %s19_s30, 4  }
 0x553   :  { %18 = sbr.rel (!%p16_p4) target bundleno = 1 (0x1), region = 89 }

</bundles_post_ra>
